<compile_context>
chip_gen: v6e
topology: v6e:2x2x1
jax: 0.10.0
libtpu: 0.0.40
codegen_flags: <defaults>
</compile_context>

<pallas_src>
import functools

import jax
import jax.numpy as jnp
import numpy as np
from jax.experimental import pallas as pl
from jax.experimental.pallas import tpu as pltpu


def _round_up(x, m):
    return ((x + m - 1) // m) * m


def _time_chunk(T, cap=8):
    # Largest divisor of T not exceeding `cap` (cap=8 keeps the v7x 64 MiB
    # VMEM budget with double-buffered activation/output tiles intact).
    for c in range(min(cap, T), 0, -1):
        if T % c == 0:
            return c
    return 1


def _vmem_limit(estimate_bytes):
    # Explicit scoped-VMEM budget: at least the 32 MiB default, never above
    # the 64 MiB physical VMEM of v7x, scaled with the actual block bytes.
    return int(min(64 * 1024 * 1024,
                   max(32 * 1024 * 1024, int(estimate_bytes * 1.5) + (1 << 20))))


@functools.lru_cache(maxsize=1)
def _num_tensorcores():
    # Megacore batch split only helps on parts with >1 TensorCore per chip.
    try:
        kind = jax.devices()[0].device_kind.lower()
    except Exception:
        return 1
    return 2 if ("v7" in kind or "7x" in kind) else 1


# ------------------------- Tiled dense (matmul + bias) ------------------------
# Used for the output head.  Weight arrives pre-cast bf16 (cast once at param
# prep); the f32 activation block is cast in-register; f32 accumulation.

def _dense_bias_kernel(x_ref, w_ref, b_ref, o_ref):
    o_ref[...] = (jnp.dot(x_ref[...].astype(jnp.bfloat16), w_ref[...],
                          preferred_element_type=jnp.float32)
                  + b_ref[...]).astype(o_ref.dtype)


def dense(x2d, w_bf16, b2d, *, tile_rows=512, tile_cols=512):
    """x2d: (N, K) f32; w_bf16: (K, F) bf16; b2d: (1, F) f32 -> (N, F) f32."""
    N, K = x2d.shape
    F = w_bf16.shape[1]
    tn = min(tile_rows, _round_up(N, 8))
    tf = min(tile_cols, _round_up(F, 128))
    Np = _round_up(N, tn)
    Fp = _round_up(F, tf)
    x_p = jnp.pad(x2d, ((0, Np - N), (0, 0))) if Np != N else x2d
    w_p = jnp.pad(w_bf16, ((0, 0), (0, Fp - F))) if Fp != F else w_bf16
    b_p = jnp.pad(b2d, ((0, 0), (0, Fp - F))) if Fp != F else b2d

    # VMEM estimate: double-buffered x/out/bias, double-buffered weight tile.
    est = (2 * tn * K * 4 + 2 * K * tf * 2 + 2 * tf * 4 + 2 * tn * tf * 4)

    # NOTE: K (= H) is kept as a single full block; for very large K add a
    # third "arbitrary" K axis with an f32 accumulator scratch.
    out = pl.pallas_call(
        _dense_bias_kernel,
        out_shape=jax.ShapeDtypeStruct((Np, Fp), jnp.float32),
        # Column (vocab) axis OUTER, row axis INNER: each (K, tf) weight tile
        # is fetched from HBM once and stays resident across the row sweep.
        grid=(Fp // tf, Np // tn),
        in_specs=[
            pl.BlockSpec((tn, K), lambda j, i: (i, 0)),
            pl.BlockSpec((K, tf), lambda j, i: (0, j)),
            pl.BlockSpec((1, tf), lambda j, i: (0, j)),
        ],
        out_specs=pl.BlockSpec((tn, tf), lambda j, i: (i, j)),
        compiler_params=pltpu.CompilerParams(
            dimension_semantics=("parallel", "parallel"),
            vmem_limit_bytes=_vmem_limit(est)),
    )(x_p, w_p, b_p)
    return out[:N, :F]


# ----------------------- Fused LSTM layer (proj + recurrence) -----------------

def _lstm_fused_kernel(x_ref, wih_ref, whh_ref, b_ref, o_ref,
                       gates_sc, hbf_sc, c_sc, *, unroll):
    # Grid is batch-chunk-outer / time-chunk-inner (row-major): a new batch
    # chunk starts its time sweep at program_id(1) == 0 -> reset carried state.
    @pl.when(pl.program_id(1) == 0)
    def _():
        hbf_sc[...] = jnp.zeros_like(hbf_sc)
        c_sc[...] = jnp.zeros_like(c_sc)

    tb, bb, E = x_ref.shape
    H = c_sc.shape[-1]
    G = 4 * H

    # Fused input projection for the whole time chunk: one MXU matmul with
    # M = t_chunk * b_chunk rows, bias folded in.  bb is a sublane multiple
    # (the wrapper pads the batch to 8), so these reshapes are layout-trivial.
    x2d = x_ref[...].reshape(tb * bb, E).astype(jnp.bfloat16)
    gx = jnp.dot(x2d, wih_ref[...], preferred_element_type=jnp.float32) + b_ref[...]
    gates_sc[...] = gx.reshape(tb, bb, G)

    whh = whh_ref[...]                         # (H, 4H) bf16, VMEM-resident

    def step(t, carry):
        # Serial critical path per step: small (bb, H) @ (H, 4H) matmul.
        gates = gates_sc[t] + jnp.dot(hbf_sc[...], whh,
                                      preferred_element_type=jnp.float32)
        # PyTorch nn.LSTM gate order (i, f, g, o): no column permutation is
        # needed when importing real checkpoints.
        s_if = jax.nn.sigmoid(gates[:, :2 * H])
        i_g = s_if[:, :H]
        f_g = s_if[:, H:]
        g_g = jnp.tanh(gates[:, 2 * H:3 * H])
        o_g = jax.nn.sigmoid(gates[:, 3 * H:])
        c = f_g * c_sc[...] + i_g * g_g
        h = o_g * jnp.tanh(c)
        c_sc[...] = c
        # bf16 copy feeds the next step's W_hh matmul directly (keeps the cast
        # off the head of the serial dependency chain); f32 h goes to HBM.
        hbf_sc[...] = h.astype(jnp.bfloat16)
        o_ref[t] = h
        return carry

    jax.lax.fori_loop(0, tb, step, 0, unroll=unroll)


def lstm_layer(x_tbe, w_ih_bf16, w_hh_bf16, bias_f32):
    """x_tbe: (T, B, E) f32; w_ih: (E, 4H) bf16; w_hh: (H, 4H) bf16;
    bias: (1, 4H) f32 (b_ih + b_hh).  Returns (T, B, H) f32."""
    T, B, E = x_tbe.shape
    H = w_hh_bf16.shape[0]
    G = 4 * H
    t_chunk = _time_chunk(T, cap=8)
    # Single TensorCore (v5e/v6e): keep the full batch per step.  Only halve
    # the batch for megacore sharding on 2-TC parts with sublane-aligned halves.
    b_chunk = B // 2 if (_num_tensorcores() >= 2 and B % 16 == 0) else B
    grid = (B // b_chunk, T // t_chunk)
    # Fully unroll the timestep loop only while the per-step gates working set
    # stays within the vreg budget; otherwise partial unroll avoids spills.
    unroll = True if (b_chunk * G * 4) <= 64 * 1024 else 2

    est = (2 * t_chunk * b_chunk * E * 4            # x tiles (double-buffered)
           + E * G * 2 + H * G * 2 + G * 4          # W_ih / W_hh / bias (single)
           + 2 * t_chunk * b_chunk * H * 4          # output tiles
           + t_chunk * b_chunk * G * 4              # gates scratch
           + b_chunk * H * (2 + 4))                 # h (bf16) + c (f32) state

    kernel = functools.partial(_lstm_fused_kernel, unroll=unroll)
    return pl.pallas_call(
        kernel,
        out_shape=jax.ShapeDtypeStruct((T, B, H), jnp.float32),
        grid_spec=pltpu.PrefetchScalarGridSpec(
            num_scalar_prefetch=0,
            grid=grid,
            in_specs=[
                pl.BlockSpec((t_chunk, b_chunk, E), lambda b, t: (t, b, 0)),
                # Constant index maps + single-buffering: fetched once, stays
                # resident, no wasted 2x VMEM allocation at large H.
                pl.BlockSpec((E, G), lambda b, t: (0, 0),
                             pipeline_mode=pl.Buffered(1)),
                pl.BlockSpec((H, G), lambda b, t: (0, 0),
                             pipeline_mode=pl.Buffered(1)),
                pl.BlockSpec((1, G), lambda b, t: (0, 0),
                             pipeline_mode=pl.Buffered(1)),
            ],
            out_specs=pl.BlockSpec((t_chunk, b_chunk, H),
                                   lambda b, t: (t, b, 0)),
            scratch_shapes=[
                pltpu.VMEM((t_chunk, b_chunk, G), jnp.float32),   # gates chunk
                pltpu.VMEM((b_chunk, H), jnp.bfloat16),           # hidden (bf16)
                pltpu.VMEM((b_chunk, H), jnp.float32),            # cell state
            ],
        ),
        compiler_params=pltpu.CompilerParams(
            dimension_semantics=("parallel", "arbitrary"),
            vmem_limit_bytes=_vmem_limit(est)),
    )(x_tbe, w_ih_bf16, w_hh_bf16, bias_f32)


# ---------------------------- Full model forward ------------------------------

def lstm_model_forward(idx, kparams):
    """idx: (B, T) int32 -> logits (B, T, vocab) f32."""
    B, T = idx.shape
    # Pad batch to a sublane multiple (8): avoids wasting 7/8 of every vreg
    # and keeps all in-kernel (t, b) <-> rows reshapes layout-trivial.
    B_p = _round_up(B, 8)
    if B_p != B:
        idx = jnp.pad(idx, ((0, B_p - B), (0, 0)))

    emb = kparams["token_emb"]
    # Embedding gather directly in time-major order (data-dependent gather is
    # left to XLA glue).
    x = jnp.take(emb, idx.T, axis=0)                       # (T, B_p, E) f32

    for layer in kparams["lstm_layers"]:
        x = lstm_layer(x, layer["w_ih_t"], layer["w_hh_t"], layer["b"])

    T_, Bp_, H = x.shape
    # One small (T,B,H)->(B,T,H) transpose so head rows come out batch-major
    # (cheaper than transposing (T,B,V) logits).  An in-kernel batch-major
    # store would be sublane-strided, so this reorder is left to XLA.
    h2d = jnp.transpose(x, (1, 0, 2)).reshape(Bp_ * T_, H)
    logits = dense(h2d, kparams["head_w_t"], kparams["head_b"])
    return logits.reshape(Bp_, T_, -1)[:B]


# ------------------------------ Parameter prep --------------------------------

def init_params(key, vocab_size, n_embd, hidden_size, num_layers):
    """f32 master parameters; LSTM weights pre-transposed to (in, 4H)/(H, 4H)
    with PyTorch's (i, f, g, o) gate-column order."""
    keys = jax.random.split(key, 2 + 4 * num_layers)
    k_emb, k_head = keys[0], keys[1]
    bound = 1.0 / np.sqrt(hidden_size)

    params = {
        "token_emb": jax.random.normal(k_emb, (vocab_size, n_embd), jnp.float32),
        "lstm_layers": [],
        "head_w_t": jax.random.uniform(k_head, (hidden_size, vocab_size),
                                       jnp.float32, -bound, bound),
        "head_b": jnp.zeros((vocab_size,), jnp.float32),
    }
    for l in range(num_layers):
        in_sz = n_embd if l == 0 else hidden_size
        k_wih, k_whh, k_bih, k_bhh = keys[2 + 4 * l: 6 + 4 * l]
        params["lstm_layers"].append({
            "w_ih_t": jax.random.uniform(k_wih, (in_sz, 4 * hidden_size),
                                         jnp.float32, -bound, bound),
            "w_hh_t": jax.random.uniform(k_whh, (hidden_size, 4 * hidden_size),
                                         jnp.float32, -bound, bound),
            "b_ih": jax.random.uniform(k_bih, (4 * hidden_size,), jnp.float32,
                                       -bound, bound),
            "b_hh": jax.random.uniform(k_bhh, (4 * hidden_size,), jnp.float32,
                                       -bound, bound),
        })
    return params


def prepare_kernel_params(params):
    """One-time prep for the kernels: cast matmul weights to bf16 exactly once
    (never per forward call) and fuse the two LSTM biases."""
    kp = {
        "token_emb": params["token_emb"],
        "head_w_t": params["head_w_t"].astype(jnp.bfloat16),
        "head_b": params["head_b"][None, :],
        "lstm_layers": [],
    }
    for lyr in params["lstm_layers"]:
        kp["lstm_layers"].append({
            "w_ih_t": lyr["w_ih_t"].astype(jnp.bfloat16),
            "w_hh_t": lyr["w_hh_t"].astype(jnp.bfloat16),
            "b": (lyr["b_ih"] + lyr["b_hh"])[None, :],     # (1, 4H) f32
        })
    return kp


# -------------------------- Pure-JAX reference (check) ------------------------

def lstm_model_reference(idx, params):
    x = jnp.take(params["token_emb"], idx, axis=0)          # (B, T, E)

    def run_layer(x_bte, lyr):
        B = x_bte.shape[0]
        H = lyr["w_hh_t"].shape[0]
        b = lyr["b_ih"] + lyr["b_hh"]

        def step(carry, x_t):
            h, c = carry
            g = x_t @ lyr["w_ih_t"] + h @ lyr["w_hh_t"] + b
            i = jax.nn.sigmoid(g[:, 0:H])
            f = jax.nn.sigmoid(g[:, H:2 * H])
            gg = jnp.tanh(g[:, 2 * H:3 * H])
            o = jax.nn.sigmoid(g[:, 3 * H:])
            c = f * c + i * gg
            h = o * jnp.tanh(c)
            return (h, c), h

        h0 = jnp.zeros((B, H), jnp.float32)
        c0 = jnp.zeros((B, H), jnp.float32)
        _, hs = jax.lax.scan(step, (h0, c0), jnp.transpose(x_bte, (1, 0, 2)))
        return jnp.transpose(hs, (1, 0, 2))

    for lyr in params["lstm_layers"]:
        x = run_layer(x, lyr)

    return x @ params["head_w_t"] + params["head_b"]


# ----------------------------------- Main -------------------------------------

if __name__ == "__main__":
    vocab_size, n_embd, hidden_size, num_layers = 64, 16, 32, 2
    B, T = 2, 8

    key = jax.random.PRNGKey(0)
    k_params, k_idx = jax.random.split(key)
    params = init_params(k_params, vocab_size, n_embd, hidden_size, num_layers)
    kparams = prepare_kernel_params(params)        # bf16 weight cast: once
    idx = jax.random.randint(k_idx, (B, T), 0, vocab_size, dtype=jnp.int32)

    logits = jax.jit(lstm_model_forward)(idx, kparams)
    logits = jax.block_until_ready(logits)

    ref = lstm_model_reference(idx, params)
    assert logits.shape == (B, T, vocab_size), logits.shape
    # bf16 matmul operands (f32 accumulation / gates / cell state) vs. f32 ref.
    np.testing.assert_allclose(np.asarray(logits), np.asarray(ref),
                               rtol=5e-2, atol=5e-2)

    print("KERNEL_OK")
</pallas_src>

<mosaic_0001>
module attributes {stable_mosaic.version = 11 : i64} {
  func.func @_dense_bias_kernel(%arg0: i32, %arg1: i32, %arg2: memref<64x32xf32, #tpu.memory_space<vmem>>, %arg3: memref<32x128xbf16, #tpu.memory_space<vmem>>, %arg4: memref<1x128xf32, #tpu.memory_space<vmem>>, %arg5: memref<64x128xf32, #tpu.memory_space<vmem>>) attributes {dimension_semantics = [#tpu.dimension_semantics<parallel>, #tpu.dimension_semantics<parallel>], iteration_bounds = array<i64: 1, 1>, scalar_prefetch = 0 : i64, scratch_operands = 0 : i64, tpu.core_type = #tpu.core_type<tc>, window_params = [{transform_indices = @transform_0, window_bounds = array<i64: 64, 32>}, {transform_indices = @transform_1, window_bounds = array<i64: 32, 128>}, {transform_indices = @transform_2, window_bounds = array<i64: 1, 128>}, {transform_indices = @transform_3, window_bounds = array<i64: 64, 128>}]} {
    %c0 = arith.constant 0 : index
    %c0_0 = arith.constant 0 : index
    %0 = vector.load %arg2[%c0, %c0_0] : memref<64x32xf32, #tpu.memory_space<vmem>>, vector<64x32xf32>
    %1 = arith.truncf %0 : vector<64x32xf32> to vector<64x32xbf16>
    %c0_1 = arith.constant 0 : index
    %c0_2 = arith.constant 0 : index
    %2 = vector.load %arg3[%c0_1, %c0_2] : memref<32x128xbf16, #tpu.memory_space<vmem>>, vector<32x128xbf16>
    %cst = arith.constant dense<0.000000e+00> : vector<64x128xf32>
    %3 = tpu.matmul %1, %2, %cst {dimension_numbers = #tpu.dot_dimension_numbers<[1], [0], [0], [1], [0, 0, 1, 1], [], []>} : vector<64x32xbf16>, vector<32x128xbf16>, vector<64x128xf32> -> vector<64x128xf32>
    %c0_3 = arith.constant 0 : index
    %c0_4 = arith.constant 0 : index
    %4 = vector.load %arg4[%c0_3, %c0_4] : memref<1x128xf32, #tpu.memory_space<vmem>>, vector<1x128xf32>
    %5 = vector.broadcast %4 : vector<1x128xf32> to vector<64x128xf32>
    %6 = arith.addf %3, %5 : vector<64x128xf32>
    %c0_5 = arith.constant 0 : index
    %c0_6 = arith.constant 0 : index
    %7 = vector.load %arg5[%c0_5, %c0_6] : memref<64x128xf32, #tpu.memory_space<vmem>>, vector<64x128xf32>
    tpu.vector_store %arg5[%c0_5, %c0_6], %6 {strides = array<i32>} : memref<64x128xf32, #tpu.memory_space<vmem>>, vector<64x128xf32>,
    return
  }
  func.func @transform_0(%arg0: i32, %arg1: i32) -> (i32, i32) {
    %c0_i32 = arith.constant 0 : i32
    %c0_i32_0 = arith.constant 0 : i32
    return %arg1, %c0_i32 : i32, i32
  }
  func.func @transform_1(%arg0: i32, %arg1: i32) -> (i32, i32) {
    %c0_i32 = arith.constant 0 : i32
    %c0_i32_0 = arith.constant 0 : i32
    return %c0_i32, %arg0 : i32, i32
  }
  func.func @transform_2(%arg0: i32, %arg1: i32) -> (i32, i32) {
    %c0_i32 = arith.constant 0 : i32
    %c0_i32_0 = arith.constant 0 : i32
    return %c0_i32, %arg0 : i32, i32
  }
  func.func @transform_3(%arg0: i32, %arg1: i32) -> (i32, i32) {
    %c0_i32 = arith.constant 0 : i32
    return %arg1, %arg0 : i32, i32
  }
}

module attributes {stable_mosaic.version = 11 : i64} {
  func.func @_lstm_fused_kernel(%arg0: i32, %arg1: i32, %arg2: memref<8x8x16xf32, #tpu.memory_space<vmem>>, %arg3: memref<16x128xbf16, #tpu.memory_space<vmem>>, %arg4: memref<32x128xbf16, #tpu.memory_space<vmem>>, %arg5: memref<1x128xf32, #tpu.memory_space<vmem>>, %arg6: memref<8x8x32xf32, #tpu.memory_space<vmem>>, %arg7: memref<8x8x128xf32, #tpu.memory_space<vmem>>, %arg8: memref<8x32xbf16, #tpu.memory_space<vmem>>, %arg9: memref<8x32xf32, #tpu.memory_space<vmem>>) attributes {dimension_semantics = [#tpu.dimension_semantics<parallel>, #tpu.dimension_semantics<arbitrary>], iteration_bounds = array<i64: 1, 1>, scalar_prefetch = 0 : i64, scratch_operands = 3 : i64, tpu.core_type = #tpu.core_type<tc>, window_params = [{transform_indices = @transform_0, window_bounds = array<i64: 8, 8, 16>}, {pipeline_mode = #tpu.pipeline_mode<synchronous>, transform_indices = @transform_1, window_bounds = array<i64: 16, 128>}, {pipeline_mode = #tpu.pipeline_mode<synchronous>, transform_indices = @transform_2, window_bounds = array<i64: 32, 128>}, {pipeline_mode = #tpu.pipeline_mode<synchronous>, transform_indices = @transform_3, window_bounds = array<i64: 1, 128>}, {transform_indices = @transform_4, window_bounds = array<i64: 8, 8, 32>}]} {
    %c0_i32 = arith.constant 0 : i32
    %0 = arith.cmpi eq, %arg1, %c0_i32 : i32
    %1 = arith.extui %0 : i1 to i32
    %c0_i32_0 = arith.constant 0 : i32
    %2 = arith.cmpi ne, %1, %c0_i32_0 : i32
    scf.if %2 {
      %cst_133 = arith.constant 0.000000e+00 : bf16
      %294 = vector.broadcast %cst_133 : bf16 to vector<8x32xbf16>
      %c0_134 = arith.constant 0 : index
      %c0_135 = arith.constant 0 : index
      %295 = vector.load %arg8[%c0_134, %c0_135] : memref<8x32xbf16, #tpu.memory_space<vmem>>, vector<8x32xbf16>
      tpu.vector_store %arg8[%c0_134, %c0_135], %294 {strides = array<i32>} : memref<8x32xbf16, #tpu.memory_space<vmem>>, vector<8x32xbf16>,
      %cst_136 = arith.constant 0.000000e+00 : f32
      %296 = vector.broadcast %cst_136 : f32 to vector<8x32xf32>
      %c0_137 = arith.constant 0 : index
      %c0_138 = arith.constant 0 : index
      %297 = vector.load %arg9[%c0_137, %c0_138] : memref<8x32xf32, #tpu.memory_space<vmem>>, vector<8x32xf32>
      tpu.vector_store %arg9[%c0_137, %c0_138], %296 {strides = array<i32>} : memref<8x32xf32, #tpu.memory_space<vmem>>, vector<8x32xf32>,
    } else {
    }
    %c0 = arith.constant 0 : index
    %c0_1 = arith.constant 0 : index
    %c0_2 = arith.constant 0 : index
    %3 = vector.load %arg2[%c0, %c0_1, %c0_2] : memref<8x8x16xf32, #tpu.memory_space<vmem>>, vector<8x8x16xf32>
    %4 = vector.shape_cast %3 : vector<8x8x16xf32> to vector<64x16xf32>
    %5 = arith.truncf %4 : vector<64x16xf32> to vector<64x16xbf16>
    %c0_3 = arith.constant 0 : index
    %c0_4 = arith.constant 0 : index
    %6 = vector.load %arg3[%c0_3, %c0_4] : memref<16x128xbf16, #tpu.memory_space<vmem>>, vector<16x128xbf16>
    %cst = arith.constant dense<0.000000e+00> : vector<64x128xf32>
    %7 = tpu.matmul %5, %6, %cst {dimension_numbers = #tpu.dot_dimension_numbers<[1], [0], [0], [1], [0, 0, 1, 1], [], []>} : vector<64x16xbf16>, vector<16x128xbf16>, vector<64x128xf32> -> vector<64x128xf32>
    %c0_5 = arith.constant 0 : index
    %c0_6 = arith.constant 0 : index
    %8 = vector.load %arg5[%c0_5, %c0_6] : memref<1x128xf32, #tpu.memory_space<vmem>>, vector<1x128xf32>
    %9 = vector.broadcast %8 : vector<1x128xf32> to vector<64x128xf32>
    %10 = arith.addf %7, %9 : vector<64x128xf32>
    %11 = vector.shape_cast %10 : vector<64x128xf32> to vector<8x8x128xf32>
    %c0_7 = arith.constant 0 : index
    %c0_8 = arith.constant 0 : index
    %c0_9 = arith.constant 0 : index
    %12 = vector.load %arg7[%c0_7, %c0_8, %c0_9] : memref<8x8x128xf32, #tpu.memory_space<vmem>>, vector<8x8x128xf32>
    tpu.vector_store %arg7[%c0_7, %c0_8, %c0_9], %11 {strides = array<i32>} : memref<8x8x128xf32, #tpu.memory_space<vmem>>, vector<8x8x128xf32>,
    %c0_10 = arith.constant 0 : index
    %c0_11 = arith.constant 0 : index
    %13 = vector.load %arg4[%c0_10, %c0_11] : memref<32x128xbf16, #tpu.memory_space<vmem>>, vector<32x128xbf16>
    %c0_i32_12 = arith.constant 0 : i32
    %14 = arith.index_cast %c0_i32_12 : i32 to index
    %c0_13 = arith.constant 0 : index
    %c0_14 = arith.constant 0 : index
    %15 = vector.load %arg7[%14, %c0_13, %c0_14] : memref<8x8x128xf32, #tpu.memory_space<vmem>>, vector<1x8x128xf32>
    %16 = vector.shape_cast %15 : vector<1x8x128xf32> to vector<8x128xf32>
    %c0_15 = arith.constant 0 : index
    %c0_16 = arith.constant 0 : index
    %17 = vector.load %arg8[%c0_15, %c0_16] : memref<8x32xbf16, #tpu.memory_space<vmem>>, vector<8x32xbf16>
    %cst_17 = arith.constant dense<0.000000e+00> : vector<8x128xf32>
    %18 = tpu.matmul %17, %13, %cst_17 {dimension_numbers = #tpu.dot_dimension_numbers<[1], [0], [0], [1], [0, 0, 1, 1], [], []>} : vector<8x32xbf16>, vector<32x128xbf16>, vector<8x128xf32> -> vector<8x128xf32>
    %19 = arith.addf %16, %18 : vector<8x128xf32>
    %20 = vector.extract_strided_slice %19 {offsets = [0, 0], sizes = [8, 64], strides = [1, 1]} : vector<8x128xf32> to vector<8x64xf32>
    %21 = arith.negf %20 : vector<8x64xf32>
    %22 = math.exp %21 : vector<8x64xf32>
    %cst_18 = arith.constant 1.000000e+00 : f32
    %23 = vector.broadcast %cst_18 : f32 to vector<8x64xf32>
    %24 = arith.addf %23, %22 : vector<8x64xf32>
    %25 = arith.divf %23, %24 : vector<8x64xf32>
    %26 = vector.extract_strided_slice %25 {offsets = [0, 0], sizes = [8, 32], strides = [1, 1]} : vector<8x64xf32> to vector<8x32xf32>
    %27 = vector.extract_strided_slice %25 {offsets = [0, 32], sizes = [8, 32], strides = [1, 1]} : vector<8x64xf32> to vector<8x32xf32>
    %28 = vector.extract_strided_slice %19 {offsets = [0, 64], sizes = [8, 32], strides = [1, 1]} : vector<8x128xf32> to vector<8x32xf32>
    %29 = math.tanh %28 : vector<8x32xf32>
    %30 = vector.extract_strided_slice %19 {offsets = [0, 96], sizes = [8, 32], strides = [1, 1]} : vector<8x128xf32> to vector<8x32xf32>
    %31 = arith.negf %30 : vector<8x32xf32>
    %32 = math.exp %31 : vector<8x32xf32>
    %cst_19 = arith.constant 1.000000e+00 : f32
    %33 = vector.broadcast %cst_19 : f32 to vector<8x32xf32>
    %34 = arith.addf %33, %32 : vector<8x32xf32>
    %35 = arith.divf %33, %34 : vector<8x32xf32>
    %c0_20 = arith.constant 0 : index
    %c0_21 = arith.constant 0 : index
    %36 = vector.load %arg9[%c0_20, %c0_21] : memref<8x32xf32, #tpu.memory_space<vmem>>, vector<8x32xf32>
    %37 = arith.mulf %27, %36 : vector<8x32xf32>
    %38 = arith.mulf %26, %29 : vector<8x32xf32>
    %39 = arith.addf %37, %38 : vector<8x32xf32>
    %40 = math.tanh %39 : vector<8x32xf32>
    %41 = arith.mulf %35, %40 : vector<8x32xf32>
    %c0_22 = arith.constant 0 : index
    %c0_23 = arith.constant 0 : index
    %42 = vector.load %arg9[%c0_22, %c0_23] : memref<8x32xf32, #tpu.memory_space<vmem>>, vector<8x32xf32>
    tpu.vector_store %arg9[%c0_22, %c0_23], %39 {strides = array<i32>} : memref<8x32xf32, #tpu.memory_space<vmem>>, vector<8x32xf32>,
    %43 = arith.truncf %41 : vector<8x32xf32> to vector<8x32xbf16>
    %c0_24 = arith.constant 0 : index
    %c0_25 = arith.constant 0 : index
    %44 = vector.load %arg8[%c0_24, %c0_25] : memref<8x32xbf16, #tpu.memory_space<vmem>>, vector<8x32xbf16>
    tpu.vector_store %arg8[%c0_24, %c0_25], %43 {strides = array<i32>} : memref<8x32xbf16, #tpu.memory_space<vmem>>, vector<8x32xbf16>,
    %45 = arith.index_cast %c0_i32_12 : i32 to index
    %c0_26 = arith.constant 0 : index
    %c0_27 = arith.constant 0 : index
    %46 = vector.load %arg6[%45, %c0_26, %c0_27] : memref<8x8x32xf32, #tpu.memory_space<vmem>>, vector<1x8x32xf32>
    %47 = vector.shape_cast %46 : vector<1x8x32xf32> to vector<8x32xf32>
    %48 = vector.shape_cast %41 : vector<8x32xf32> to vector<1x8x32xf32>
    tpu.vector_store %arg6[%45, %c0_26, %c0_27], %48 {strides = array<i32>} : memref<8x8x32xf32, #tpu.memory_space<vmem>>, vector<1x8x32xf32>,
    %c1_i32 = arith.constant 1 : i32
    %49 = arith.index_cast %c1_i32 : i32 to index
    %c0_28 = arith.constant 0 : index
    %c0_29 = arith.constant 0 : index
    %50 = vector.load %arg7[%49, %c0_28, %c0_29] : memref<8x8x128xf32, #tpu.memory_space<vmem>>, vector<1x8x128xf32>
    %51 = vector.shape_cast %50 : vector<1x8x128xf32> to vector<8x128xf32>
    %c0_30 = arith.constant 0 : index
    %c0_31 = arith.constant 0 : index
    %52 = vector.load %arg8[%c0_30, %c0_31] : memref<8x32xbf16, #tpu.memory_space<vmem>>, vector<8x32xbf16>
    %cst_32 = arith.constant dense<0.000000e+00> : vector<8x128xf32>
    %53 = tpu.matmul %52, %13, %cst_32 {dimension_numbers = #tpu.dot_dimension_numbers<[1], [0], [0], [1], [0, 0, 1, 1], [], []>} : vector<8x32xbf16>, vector<32x128xbf16>, vector<8x128xf32> -> vector<8x128xf32>
    %54 = arith.addf %51, %53 : vector<8x128xf32>
    %55 = vector.extract_strided_slice %54 {offsets = [0, 0], sizes = [8, 64], strides = [1, 1]} : vector<8x128xf32> to vector<8x64xf32>
    %56 = arith.negf %55 : vector<8x64xf32>
    %57 = math.exp %56 : vector<8x64xf32>
    %cst_33 = arith.constant 1.000000e+00 : f32
    %58 = vector.broadcast %cst_33 : f32 to vector<8x64xf32>
    %59 = arith.addf %58, %57 : vector<8x64xf32>
    %60 = arith.divf %58, %59 : vector<8x64xf32>
    %61 = vector.extract_strided_slice %60 {offsets = [0, 0], sizes = [8, 32], strides = [1, 1]} : vector<8x64xf32> to vector<8x32xf32>
    %62 = vector.extract_strided_slice %60 {offsets = [0, 32], sizes = [8, 32], strides = [1, 1]} : vector<8x64xf32> to vector<8x32xf32>
    %63 = vector.extract_strided_slice %54 {offsets = [0, 64], sizes = [8, 32], strides = [1, 1]} : vector<8x128xf32> to vector<8x32xf32>
    %64 = math.tanh %63 : vector<8x32xf32>
    %65 = vector.extract_strided_slice %54 {offsets = [0, 96], sizes = [8, 32], strides = [1, 1]} : vector<8x128xf32> to vector<8x32xf32>
    %66 = arith.negf %65 : vector<8x32xf32>
    %67 = math.exp %66 : vector<8x32xf32>
    %cst_34 = arith.constant 1.000000e+00 : f32
    %68 = vector.broadcast %cst_34 : f32 to vector<8x32xf32>
    %69 = arith.addf %68, %67 : vector<8x32xf32>
    %70 = arith.divf %68, %69 : vector<8x32xf32>
    %c0_35 = arith.constant 0 : index
    %c0_36 = arith.constant 0 : index
    %71 = vector.load %arg9[%c0_35, %c0_36] : memref<8x32xf32, #tpu.memory_space<vmem>>, vector<8x32xf32>
    %72 = arith.mulf %62, %71 : vector<8x32xf32>
    %73 = arith.mulf %61, %64 : vector<8x32xf32>
    %74 = arith.addf %72, %73 : vector<8x32xf32>
    %75 = math.tanh %74 : vector<8x32xf32>
    %76 = arith.mulf %70, %75 : vector<8x32xf32>
    %c0_37 = arith.constant 0 : index
    %c0_38 = arith.constant 0 : index
    %77 = vector.load %arg9[%c0_37, %c0_38] : memref<8x32xf32, #tpu.memory_space<vmem>>, vector<8x32xf32>
    tpu.vector_store %arg9[%c0_37, %c0_38], %74 {strides = array<i32>} : memref<8x32xf32, #tpu.memory_space<vmem>>, vector<8x32xf32>,
    %78 = arith.truncf %76 : vector<8x32xf32> to vector<8x32xbf16>
    %c0_39 = arith.constant 0 : index
    %c0_40 = arith.constant 0 : index
    %79 = vector.load %arg8[%c0_39, %c0_40] : memref<8x32xbf16, #tpu.memory_space<vmem>>, vector<8x32xbf16>
    tpu.vector_store %arg8[%c0_39, %c0_40], %78 {strides = array<i32>} : memref<8x32xbf16, #tpu.memory_space<vmem>>, vector<8x32xbf16>,
    %80 = arith.index_cast %c1_i32 : i32 to index
    %c0_41 = arith.constant 0 : index
    %c0_42 = arith.constant 0 : index
    %81 = vector.load %arg6[%80, %c0_41, %c0_42] : memref<8x8x32xf32, #tpu.memory_space<vmem>>, vector<1x8x32xf32>
    %82 = vector.shape_cast %81 : vector<1x8x32xf32> to vector<8x32xf32>
    %83 = vector.shape_cast %76 : vector<8x32xf32> to vector<1x8x32xf32>
    tpu.vector_store %arg6[%80, %c0_41, %c0_42], %83 {strides = array<i32>} : memref<8x8x32xf32, #tpu.memory_space<vmem>>, vector<1x8x32xf32>,
    %c2_i32 = arith.constant 2 : i32
    %84 = arith.index_cast %c2_i32 : i32 to index
    %c0_43 = arith.constant 0 : index
    %c0_44 = arith.constant 0 : index
    %85 = vector.load %arg7[%84, %c0_43, %c0_44] : memref<8x8x128xf32, #tpu.memory_space<vmem>>, vector<1x8x128xf32>
    %86 = vector.shape_cast %85 : vector<1x8x128xf32> to vector<8x128xf32>
    %c0_45 = arith.constant 0 : index
    %c0_46 = arith.constant 0 : index
    %87 = vector.load %arg8[%c0_45, %c0_46] : memref<8x32xbf16, #tpu.memory_space<vmem>>, vector<8x32xbf16>
    %cst_47 = arith.constant dense<0.000000e+00> : vector<8x128xf32>
    %88 = tpu.matmul %87, %13, %cst_47 {dimension_numbers = #tpu.dot_dimension_numbers<[1], [0], [0], [1], [0, 0, 1, 1], [], []>} : vector<8x32xbf16>, vector<32x128xbf16>, vector<8x128xf32> -> vector<8x128xf32>
    %89 = arith.addf %86, %88 : vector<8x128xf32>
    %90 = vector.extract_strided_slice %89 {offsets = [0, 0], sizes = [8, 64], strides = [1, 1]} : vector<8x128xf32> to vector<8x64xf32>
    %91 = arith.negf %90 : vector<8x64xf32>
    %92 = math.exp %91 : vector<8x64xf32>
    %cst_48 = arith.constant 1.000000e+00 : f32
    %93 = vector.broadcast %cst_48 : f32 to vector<8x64xf32>
    %94 = arith.addf %93, %92 : vector<8x64xf32>
    %95 = arith.divf %93, %94 : vector<8x64xf32>
    %96 = vector.extract_strided_slice %95 {offsets = [0, 0], sizes = [8, 32], strides = [1, 1]} : vector<8x64xf32> to vector<8x32xf32>
    %97 = vector.extract_strided_slice %95 {offsets = [0, 32], sizes = [8, 32], strides = [1, 1]} : vector<8x64xf32> to vector<8x32xf32>
    %98 = vector.extract_strided_slice %89 {offsets = [0, 64], sizes = [8, 32], strides = [1, 1]} : vector<8x128xf32> to vector<8x32xf32>
    %99 = math.tanh %98 : vector<8x32xf32>
    %100 = vector.extract_strided_slice %89 {offsets = [0, 96], sizes = [8, 32], strides = [1, 1]} : vector<8x128xf32> to vector<8x32xf32>
    %101 = arith.negf %100 : vector<8x32xf32>
    %102 = math.exp %101 : vector<8x32xf32>
    %cst_49 = arith.constant 1.000000e+00 : f32
    %103 = vector.broadcast %cst_49 : f32 to vector<8x32xf32>
    %104 = arith.addf %103, %102 : vector<8x32xf32>
    %105 = arith.divf %103, %104 : vector<8x32xf32>
    %c0_50 = arith.constant 0 : index
    %c0_51 = arith.constant 0 : index
    %106 = vector.load %arg9[%c0_50, %c0_51] : memref<8x32xf32, #tpu.memory_space<vmem>>, vector<8x32xf32>
    %107 = arith.mulf %97, %106 : vector<8x32xf32>
    %108 = arith.mulf %96, %99 : vector<8x32xf32>
    %109 = arith.addf %107, %108 : vector<8x32xf32>
    %110 = math.tanh %109 : vector<8x32xf32>
    %111 = arith.mulf %105, %110 : vector<8x32xf32>
    %c0_52 = arith.constant 0 : index
    %c0_53 = arith.constant 0 : index
    %112 = vector.load %arg9[%c0_52, %c0_53] : memref<8x32xf32, #tpu.memory_space<vmem>>, vector<8x32xf32>
    tpu.vector_store %arg9[%c0_52, %c0_53], %109 {strides = array<i32>} : memref<8x32xf32, #tpu.memory_space<vmem>>, vector<8x32xf32>,
    %113 = arith.truncf %111 : vector<8x32xf32> to vector<8x32xbf16>
    %c0_54 = arith.constant 0 : index
    %c0_55 = arith.constant 0 : index
    %114 = vector.load %arg8[%c0_54, %c0_55] : memref<8x32xbf16, #tpu.memory_space<vmem>>, vector<8x32xbf16>
    tpu.vector_store %arg8[%c0_54, %c0_55], %113 {strides = array<i32>} : memref<8x32xbf16, #tpu.memory_space<vmem>>, vector<8x32xbf16>,
    %115 = arith.index_cast %c2_i32 : i32 to index
    %c0_56 = arith.constant 0 : index
    %c0_57 = arith.constant 0 : index
    %116 = vector.load %arg6[%115, %c0_56, %c0_57] : memref<8x8x32xf32, #tpu.memory_space<vmem>>, vector<1x8x32xf32>
    %117 = vector.shape_cast %116 : vector<1x8x32xf32> to vector<8x32xf32>
    %118 = vector.shape_cast %111 : vector<8x32xf32> to vector<1x8x32xf32>
    tpu.vector_store %arg6[%115, %c0_56, %c0_57], %118 {strides = array<i32>} : memref<8x8x32xf32, #tpu.memory_space<vmem>>, vector<1x8x32xf32>,
    %c3_i32 = arith.constant 3 : i32
    %119 = arith.index_cast %c3_i32 : i32 to index
    %c0_58 = arith.constant 0 : index
    %c0_59 = arith.constant 0 : index
    %120 = vector.load %arg7[%119, %c0_58, %c0_59] : memref<8x8x128xf32, #tpu.memory_space<vmem>>, vector<1x8x128xf32>
    %121 = vector.shape_cast %120 : vector<1x8x128xf32> to vector<8x128xf32>
    %c0_60 = arith.constant 0 : index
    %c0_61 = arith.constant 0 : index
    %122 = vector.load %arg8[%c0_60, %c0_61] : memref<8x32xbf16, #tpu.memory_space<vmem>>, vector<8x32xbf16>
    %cst_62 = arith.constant dense<0.000000e+00> : vector<8x128xf32>
    %123 = tpu.matmul %122, %13, %cst_62 {dimension_numbers = #tpu.dot_dimension_numbers<[1], [0], [0], [1], [0, 0, 1, 1], [], []>} : vector<8x32xbf16>, vector<32x128xbf16>, vector<8x128xf32> -> vector<8x128xf32>
    %124 = arith.addf %121, %123 : vector<8x128xf32>
    %125 = vector.extract_strided_slice %124 {offsets = [0, 0], sizes = [8, 64], strides = [1, 1]} : vector<8x128xf32> to vector<8x64xf32>
    %126 = arith.negf %125 : vector<8x64xf32>
    %127 = math.exp %126 : vector<8x64xf32>
    %cst_63 = arith.constant 1.000000e+00 : f32
    %128 = vector.broadcast %cst_63 : f32 to vector<8x64xf32>
    %129 = arith.addf %128, %127 : vector<8x64xf32>
    %130 = arith.divf %128, %129 : vector<8x64xf32>
    %131 = vector.extract_strided_slice %130 {offsets = [0, 0], sizes = [8, 32], strides = [1, 1]} : vector<8x64xf32> to vector<8x32xf32>
    %132 = vector.extract_strided_slice %130 {offsets = [0, 32], sizes = [8, 32], strides = [1, 1]} : vector<8x64xf32> to vector<8x32xf32>
    %133 = vector.extract_strided_slice %124 {offsets = [0, 64], sizes = [8, 32], strides = [1, 1]} : vector<8x128xf32> to vector<8x32xf32>
    %134 = math.tanh %133 : vector<8x32xf32>
    %135 = vector.extract_strided_slice %124 {offsets = [0, 96], sizes = [8, 32], strides = [1, 1]} : vector<8x128xf32> to vector<8x32xf32>
    %136 = arith.negf %135 : vector<8x32xf32>
    %137 = math.exp %136 : vector<8x32xf32>
    %cst_64 = arith.constant 1.000000e+00 : f32
    %138 = vector.broadcast %cst_64 : f32 to vector<8x32xf32>
    %139 = arith.addf %138, %137 : vector<8x32xf32>
    %140 = arith.divf %138, %139 : vector<8x32xf32>
    %c0_65 = arith.constant 0 : index
    %c0_66 = arith.constant 0 : index
    %141 = vector.load %arg9[%c0_65, %c0_66] : memref<8x32xf32, #tpu.memory_space<vmem>>, vector<8x32xf32>
    %142 = arith.mulf %132, %141 : vector<8x32xf32>
    %143 = arith.mulf %131, %134 : vector<8x32xf32>
    %144 = arith.addf %142, %143 : vector<8x32xf32>
    %145 = math.tanh %144 : vector<8x32xf32>
    %146 = arith.mulf %140, %145 : vector<8x32xf32>
    %c0_67 = arith.constant 0 : index
    %c0_68 = arith.constant 0 : index
    %147 = vector.load %arg9[%c0_67, %c0_68] : memref<8x32xf32, #tpu.memory_space<vmem>>, vector<8x32xf32>
    tpu.vector_store %arg9[%c0_67, %c0_68], %144 {strides = array<i32>} : memref<8x32xf32, #tpu.memory_space<vmem>>, vector<8x32xf32>,
    %148 = arith.truncf %146 : vector<8x32xf32> to vector<8x32xbf16>
    %c0_69 = arith.constant 0 : index
    %c0_70 = arith.constant 0 : index
    %149 = vector.load %arg8[%c0_69, %c0_70] : memref<8x32xbf16, #tpu.memory_space<vmem>>, vector<8x32xbf16>
    tpu.vector_store %arg8[%c0_69, %c0_70], %148 {strides = array<i32>} : memref<8x32xbf16, #tpu.memory_space<vmem>>, vector<8x32xbf16>,
    %150 = arith.index_cast %c3_i32 : i32 to index
    %c0_71 = arith.constant 0 : index
    %c0_72 = arith.constant 0 : index
    %151 = vector.load %arg6[%150, %c0_71, %c0_72] : memref<8x8x32xf32, #tpu.memory_space<vmem>>, vector<1x8x32xf32>
    %152 = vector.shape_cast %151 : vector<1x8x32xf32> to vector<8x32xf32>
    %153 = vector.shape_cast %146 : vector<8x32xf32> to vector<1x8x32xf32>
    tpu.vector_store %arg6[%150, %c0_71, %c0_72], %153 {strides = array<i32>} : memref<8x8x32xf32, #tpu.memory_space<vmem>>, vector<1x8x32xf32>,
    %c4_i32 = arith.constant 4 : i32
    %154 = arith.index_cast %c4_i32 : i32 to index
    %c0_73 = arith.constant 0 : index
    %c0_74 = arith.constant 0 : index
    %155 = vector.load %arg7[%154, %c0_73, %c0_74] : memref<8x8x128xf32, #tpu.memory_space<vmem>>, vector<1x8x128xf32>
    %156 = vector.shape_cast %155 : vector<1x8x128xf32> to vector<8x128xf32>
    %c0_75 = arith.constant 0 : index
    %c0_76 = arith.constant 0 : index
    %157 = vector.load %arg8[%c0_75, %c0_76] : memref<8x32xbf16, #tpu.memory_space<vmem>>, vector<8x32xbf16>
    %cst_77 = arith.constant dense<0.000000e+00> : vector<8x128xf32>
    %158 = tpu.matmul %157, %13, %cst_77 {dimension_numbers = #tpu.dot_dimension_numbers<[1], [0], [0], [1], [0, 0, 1, 1], [], []>} : vector<8x32xbf16>, vector<32x128xbf16>, vector<8x128xf32> -> vector<8x128xf32>
    %159 = arith.addf %156, %158 : vector<8x128xf32>
    %160 = vector.extract_strided_slice %159 {offsets = [0, 0], sizes = [8, 64], strides = [1, 1]} : vector<8x128xf32> to vector<8x64xf32>
    %161 = arith.negf %160 : vector<8x64xf32>
    %162 = math.exp %161 : vector<8x64xf32>
    %cst_78 = arith.constant 1.000000e+00 : f32
    %163 = vector.broadcast %cst_78 : f32 to vector<8x64xf32>
    %164 = arith.addf %163, %162 : vector<8x64xf32>
    %165 = arith.divf %163, %164 : vector<8x64xf32>
    %166 = vector.extract_strided_slice %165 {offsets = [0, 0], sizes = [8, 32], strides = [1, 1]} : vector<8x64xf32> to vector<8x32xf32>
    %167 = vector.extract_strided_slice %165 {offsets = [0, 32], sizes = [8, 32], strides = [1, 1]} : vector<8x64xf32> to vector<8x32xf32>
    %168 = vector.extract_strided_slice %159 {offsets = [0, 64], sizes = [8, 32], strides = [1, 1]} : vector<8x128xf32> to vector<8x32xf32>
    %169 = math.tanh %168 : vector<8x32xf32>
    %170 = vector.extract_strided_slice %159 {offsets = [0, 96], sizes = [8, 32], strides = [1, 1]} : vector<8x128xf32> to vector<8x32xf32>
    %171 = arith.negf %170 : vector<8x32xf32>
    %172 = math.exp %171 : vector<8x32xf32>
    %cst_79 = arith.constant 1.000000e+00 : f32
    %173 = vector.broadcast %cst_79 : f32 to vector<8x32xf32>
    %174 = arith.addf %173, %172 : vector<8x32xf32>
    %175 = arith.divf %173, %174 : vector<8x32xf32>
    %c0_80 = arith.constant 0 : index
    %c0_81 = arith.constant 0 : index
    %176 = vector.load %arg9[%c0_80, %c0_81] : memref<8x32xf32, #tpu.memory_space<vmem>>, vector<8x32xf32>
    %177 = arith.mulf %167, %176 : vector<8x32xf32>
    %178 = arith.mulf %166, %169 : vector<8x32xf32>
    %179 = arith.addf %177, %178 : vector<8x32xf32>
    %180 = math.tanh %179 : vector<8x32xf32>
    %181 = arith.mulf %175, %180 : vector<8x32xf32>
    %c0_82 = arith.constant 0 : index
    %c0_83 = arith.constant 0 : index
    %182 = vector.load %arg9[%c0_82, %c0_83] : memref<8x32xf32, #tpu.memory_space<vmem>>, vector<8x32xf32>
    tpu.vector_store %arg9[%c0_82, %c0_83], %179 {strides = array<i32>} : memref<8x32xf32, #tpu.memory_space<vmem>>, vector<8x32xf32>,
    %183 = arith.truncf %181 : vector<8x32xf32> to vector<8x32xbf16>
    %c0_84 = arith.constant 0 : index
    %c0_85 = arith.constant 0 : index
    %184 = vector.load %arg8[%c0_84, %c0_85] : memref<8x32xbf16, #tpu.memory_space<vmem>>, vector<8x32xbf16>
    tpu.vector_store %arg8[%c0_84, %c0_85], %183 {strides = array<i32>} : memref<8x32xbf16, #tpu.memory_space<vmem>>, vector<8x32xbf16>,
    %185 = arith.index_cast %c4_i32 : i32 to index
    %c0_86 = arith.constant 0 : index
    %c0_87 = arith.constant 0 : index
    %186 = vector.load %arg6[%185, %c0_86, %c0_87] : memref<8x8x32xf32, #tpu.memory_space<vmem>>, vector<1x8x32xf32>
    %187 = vector.shape_cast %186 : vector<1x8x32xf32> to vector<8x32xf32>
    %188 = vector.shape_cast %181 : vector<8x32xf32> to vector<1x8x32xf32>
    tpu.vector_store %arg6[%185, %c0_86, %c0_87], %188 {strides = array<i32>} : memref<8x8x32xf32, #tpu.memory_space<vmem>>, vector<1x8x32xf32>,
    %c5_i32 = arith.constant 5 : i32
    %189 = arith.index_cast %c5_i32 : i32 to index
    %c0_88 = arith.constant 0 : index
    %c0_89 = arith.constant 0 : index
    %190 = vector.load %arg7[%189, %c0_88, %c0_89] : memref<8x8x128xf32, #tpu.memory_space<vmem>>, vector<1x8x128xf32>
    %191 = vector.shape_cast %190 : vector<1x8x128xf32> to vector<8x128xf32>
    %c0_90 = arith.constant 0 : index
    %c0_91 = arith.constant 0 : index
    %192 = vector.load %arg8[%c0_90, %c0_91] : memref<8x32xbf16, #tpu.memory_space<vmem>>, vector<8x32xbf16>
    %cst_92 = arith.constant dense<0.000000e+00> : vector<8x128xf32>
    %193 = tpu.matmul %192, %13, %cst_92 {dimension_numbers = #tpu.dot_dimension_numbers<[1], [0], [0], [1], [0, 0, 1, 1], [], []>} : vector<8x32xbf16>, vector<32x128xbf16>, vector<8x128xf32> -> vector<8x128xf32>
    %194 = arith.addf %191, %193 : vector<8x128xf32>
    %195 = vector.extract_strided_slice %194 {offsets = [0, 0], sizes = [8, 64], strides = [1, 1]} : vector<8x128xf32> to vector<8x64xf32>
    %196 = arith.negf %195 : vector<8x64xf32>
    %197 = math.exp %196 : vector<8x64xf32>
    %cst_93 = arith.constant 1.000000e+00 : f32
    %198 = vector.broadcast %cst_93 : f32 to vector<8x64xf32>
    %199 = arith.addf %198, %197 : vector<8x64xf32>
    %200 = arith.divf %198, %199 : vector<8x64xf32>
    %201 = vector.extract_strided_slice %200 {offsets = [0, 0], sizes = [8, 32], strides = [1, 1]} : vector<8x64xf32> to vector<8x32xf32>
    %202 = vector.extract_strided_slice %200 {offsets = [0, 32], sizes = [8, 32], strides = [1, 1]} : vector<8x64xf32> to vector<8x32xf32>
    %203 = vector.extract_strided_slice %194 {offsets = [0, 64], sizes = [8, 32], strides = [1, 1]} : vector<8x128xf32> to vector<8x32xf32>
    %204 = math.tanh %203 : vector<8x32xf32>
    %205 = vector.extract_strided_slice %194 {offsets = [0, 96], sizes = [8, 32], strides = [1, 1]} : vector<8x128xf32> to vector<8x32xf32>
    %206 = arith.negf %205 : vector<8x32xf32>
    %207 = math.exp %206 : vector<8x32xf32>
    %cst_94 = arith.constant 1.000000e+00 : f32
    %208 = vector.broadcast %cst_94 : f32 to vector<8x32xf32>
    %209 = arith.addf %208, %207 : vector<8x32xf32>
    %210 = arith.divf %208, %209 : vector<8x32xf32>
    %c0_95 = arith.constant 0 : index
    %c0_96 = arith.constant 0 : index
    %211 = vector.load %arg9[%c0_95, %c0_96] : memref<8x32xf32, #tpu.memory_space<vmem>>, vector<8x32xf32>
    %212 = arith.mulf %202, %211 : vector<8x32xf32>
    %213 = arith.mulf %201, %204 : vector<8x32xf32>
    %214 = arith.addf %212, %213 : vector<8x32xf32>
    %215 = math.tanh %214 : vector<8x32xf32>
    %216 = arith.mulf %210, %215 : vector<8x32xf32>
    %c0_97 = arith.constant 0 : index
    %c0_98 = arith.constant 0 : index
    %217 = vector.load %arg9[%c0_97, %c0_98] : memref<8x32xf32, #tpu.memory_space<vmem>>, vector<8x32xf32>
    tpu.vector_store %arg9[%c0_97, %c0_98], %214 {strides = array<i32>} : memref<8x32xf32, #tpu.memory_space<vmem>>, vector<8x32xf32>,
    %218 = arith.truncf %216 : vector<8x32xf32> to vector<8x32xbf16>
    %c0_99 = arith.constant 0 : index
    %c0_100 = arith.constant 0 : index
    %219 = vector.load %arg8[%c0_99, %c0_100] : memref<8x32xbf16, #tpu.memory_space<vmem>>, vector<8x32xbf16>
    tpu.vector_store %arg8[%c0_99, %c0_100], %218 {strides = array<i32>} : memref<8x32xbf16, #tpu.memory_space<vmem>>, vector<8x32xbf16>,
    %220 = arith.index_cast %c5_i32 : i32 to index
    %c0_101 = arith.constant 0 : index
    %c0_102 = arith.constant 0 : index
    %221 = vector.load %arg6[%220, %c0_101, %c0_102] : memref<8x8x32xf32, #tpu.memory_space<vmem>>, vector<1x8x32xf32>
    %222 = vector.shape_cast %221 : vector<1x8x32xf32> to vector<8x32xf32>
    %223 = vector.shape_cast %216 : vector<8x32xf32> to vector<1x8x32xf32>
    tpu.vector_store %arg6[%220, %c0_101, %c0_102], %223 {strides = array<i32>} : memref<8x8x32xf32, #tpu.memory_space<vmem>>, vector<1x8x32xf32>,
    %c6_i32 = arith.constant 6 : i32
    %224 = arith.index_cast %c6_i32 : i32 to index
    %c0_103 = arith.constant 0 : index
    %c0_104 = arith.constant 0 : index
    %225 = vector.load %arg7[%224, %c0_103, %c0_104] : memref<8x8x128xf32, #tpu.memory_space<vmem>>, vector<1x8x128xf32>
    %226 = vector.shape_cast %225 : vector<1x8x128xf32> to vector<8x128xf32>
    %c0_105 = arith.constant 0 : index
    %c0_106 = arith.constant 0 : index
    %227 = vector.load %arg8[%c0_105, %c0_106] : memref<8x32xbf16, #tpu.memory_space<vmem>>, vector<8x32xbf16>
    %cst_107 = arith.constant dense<0.000000e+00> : vector<8x128xf32>
    %228 = tpu.matmul %227, %13, %cst_107 {dimension_numbers = #tpu.dot_dimension_numbers<[1], [0], [0], [1], [0, 0, 1, 1], [], []>} : vector<8x32xbf16>, vector<32x128xbf16>, vector<8x128xf32> -> vector<8x128xf32>
    %229 = arith.addf %226, %228 : vector<8x128xf32>
    %230 = vector.extract_strided_slice %229 {offsets = [0, 0], sizes = [8, 64], strides = [1, 1]} : vector<8x128xf32> to vector<8x64xf32>
    %231 = arith.negf %230 : vector<8x64xf32>
    %232 = math.exp %231 : vector<8x64xf32>
    %cst_108 = arith.constant 1.000000e+00 : f32
    %233 = vector.broadcast %cst_108 : f32 to vector<8x64xf32>
    %234 = arith.addf %233, %232 : vector<8x64xf32>
    %235 = arith.divf %233, %234 : vector<8x64xf32>
    %236 = vector.extract_strided_slice %235 {offsets = [0, 0], sizes = [8, 32], strides = [1, 1]} : vector<8x64xf32> to vector<8x32xf32>
    %237 = vector.extract_strided_slice %235 {offsets = [0, 32], sizes = [8, 32], strides = [1, 1]} : vector<8x64xf32> to vector<8x32xf32>
    %238 = vector.extract_strided_slice %229 {offsets = [0, 64], sizes = [8, 32], strides = [1, 1]} : vector<8x128xf32> to vector<8x32xf32>
    %239 = math.tanh %238 : vector<8x32xf32>
    %240 = vector.extract_strided_slice %229 {offsets = [0, 96], sizes = [8, 32], strides = [1, 1]} : vector<8x128xf32> to vector<8x32xf32>
    %241 = arith.negf %240 : vector<8x32xf32>
    %242 = math.exp %241 : vector<8x32xf32>
    %cst_109 = arith.constant 1.000000e+00 : f32
    %243 = vector.broadcast %cst_109 : f32 to vector<8x32xf32>
    %244 = arith.addf %243, %242 : vector<8x32xf32>
    %245 = arith.divf %243, %244 : vector<8x32xf32>
    %c0_110 = arith.constant 0 : index
    %c0_111 = arith.constant 0 : index
    %246 = vector.load %arg9[%c0_110, %c0_111] : memref<8x32xf32, #tpu.memory_space<vmem>>, vector<8x32xf32>
    %247 = arith.mulf %237, %246 : vector<8x32xf32>
    %248 = arith.mulf %236, %239 : vector<8x32xf32>
    %249 = arith.addf %247, %248 : vector<8x32xf32>
    %250 = math.tanh %249 : vector<8x32xf32>
    %251 = arith.mulf %245, %250 : vector<8x32xf32>
    %c0_112 = arith.constant 0 : index
    %c0_113 = arith.constant 0 : index
    %252 = vector.load %arg9[%c0_112, %c0_113] : memref<8x32xf32, #tpu.memory_space<vmem>>, vector<8x32xf32>
    tpu.vector_store %arg9[%c0_112, %c0_113], %249 {strides = array<i32>} : memref<8x32xf32, #tpu.memory_space<vmem>>, vector<8x32xf32>,
    %253 = arith.truncf %251 : vector<8x32xf32> to vector<8x32xbf16>
    %c0_114 = arith.constant 0 : index
    %c0_115 = arith.constant 0 : index
    %254 = vector.load %arg8[%c0_114, %c0_115] : memref<8x32xbf16, #tpu.memory_space<vmem>>, vector<8x32xbf16>
    tpu.vector_store %arg8[%c0_114, %c0_115], %253 {strides = array<i32>} : memref<8x32xbf16, #tpu.memory_space<vmem>>, vector<8x32xbf16>,
    %255 = arith.index_cast %c6_i32 : i32 to index
    %c0_116 = arith.constant 0 : index
    %c0_117 = arith.constant 0 : index
    %256 = vector.load %arg6[%255, %c0_116, %c0_117] : memref<8x8x32xf32, #tpu.memory_space<vmem>>, vector<1x8x32xf32>
    %257 = vector.shape_cast %256 : vector<1x8x32xf32> to vector<8x32xf32>
    %258 = vector.shape_cast %251 : vector<8x32xf32> to vector<1x8x32xf32>
    tpu.vector_store %arg6[%255, %c0_116, %c0_117], %258 {strides = array<i32>} : memref<8x8x32xf32, #tpu.memory_space<vmem>>, vector<1x8x32xf32>,
    %c7_i32 = arith.constant 7 : i32
    %259 = arith.index_cast %c7_i32 : i32 to index
    %c0_118 = arith.constant 0 : index
    %c0_119 = arith.constant 0 : index
    %260 = vector.load %arg7[%259, %c0_118, %c0_119] : memref<8x8x128xf32, #tpu.memory_space<vmem>>, vector<1x8x128xf32>
    %261 = vector.shape_cast %260 : vector<1x8x128xf32> to vector<8x128xf32>
    %c0_120 = arith.constant 0 : index
    %c0_121 = arith.constant 0 : index
    %262 = vector.load %arg8[%c0_120, %c0_121] : memref<8x32xbf16, #tpu.memory_space<vmem>>, vector<8x32xbf16>
    %cst_122 = arith.constant dense<0.000000e+00> : vector<8x128xf32>
    %263 = tpu.matmul %262, %13, %cst_122 {dimension_numbers = #tpu.dot_dimension_numbers<[1], [0], [0], [1], [0, 0, 1, 1], [], []>} : vector<8x32xbf16>, vector<32x128xbf16>, vector<8x128xf32> -> vector<8x128xf32>
    %264 = arith.addf %261, %263 : vector<8x128xf32>
    %265 = vector.extract_strided_slice %264 {offsets = [0, 0], sizes = [8, 64], strides = [1, 1]} : vector<8x128xf32> to vector<8x64xf32>
    %266 = arith.negf %265 : vector<8x64xf32>
    %267 = math.exp %266 : vector<8x64xf32>
    %cst_123 = arith.constant 1.000000e+00 : f32
    %268 = vector.broadcast %cst_123 : f32 to vector<8x64xf32>
    %269 = arith.addf %268, %267 : vector<8x64xf32>
    %270 = arith.divf %268, %269 : vector<8x64xf32>
    %271 = vector.extract_strided_slice %270 {offsets = [0, 0], sizes = [8, 32], strides = [1, 1]} : vector<8x64xf32> to vector<8x32xf32>
    %272 = vector.extract_strided_slice %270 {offsets = [0, 32], sizes = [8, 32], strides = [1, 1]} : vector<8x64xf32> to vector<8x32xf32>
    %273 = vector.extract_strided_slice %264 {offsets = [0, 64], sizes = [8, 32], strides = [1, 1]} : vector<8x128xf32> to vector<8x32xf32>
    %274 = math.tanh %273 : vector<8x32xf32>
    %275 = vector.extract_strided_slice %264 {offsets = [0, 96], sizes = [8, 32], strides = [1, 1]} : vector<8x128xf32> to vector<8x32xf32>
    %276 = arith.negf %275 : vector<8x32xf32>
    %277 = math.exp %276 : vector<8x32xf32>
    %cst_124 = arith.constant 1.000000e+00 : f32
    %278 = vector.broadcast %cst_124 : f32 to vector<8x32xf32>
    %279 = arith.addf %278, %277 : vector<8x32xf32>
    %280 = arith.divf %278, %279 : vector<8x32xf32>
    %c0_125 = arith.constant 0 : index
    %c0_126 = arith.constant 0 : index
    %281 = vector.load %arg9[%c0_125, %c0_126] : memref<8x32xf32, #tpu.memory_space<vmem>>, vector<8x32xf32>
    %282 = arith.mulf %272, %281 : vector<8x32xf32>
    %283 = arith.mulf %271, %274 : vector<8x32xf32>
    %284 = arith.addf %282, %283 : vector<8x32xf32>
    %285 = math.tanh %284 : vector<8x32xf32>
    %286 = arith.mulf %280, %285 : vector<8x32xf32>
    %c0_127 = arith.constant 0 : index
    %c0_128 = arith.constant 0 : index
    %287 = vector.load %arg9[%c0_127, %c0_128] : memref<8x32xf32, #tpu.memory_space<vmem>>, vector<8x32xf32>
    tpu.vector_store %arg9[%c0_127, %c0_128], %284 {strides = array<i32>} : memref<8x32xf32, #tpu.memory_space<vmem>>, vector<8x32xf32>,
    %288 = arith.truncf %286 : vector<8x32xf32> to vector<8x32xbf16>
    %c0_129 = arith.constant 0 : index
    %c0_130 = arith.constant 0 : index
    %289 = vector.load %arg8[%c0_129, %c0_130] : memref<8x32xbf16, #tpu.memory_space<vmem>>, vector<8x32xbf16>
    tpu.vector_store %arg8[%c0_129, %c0_130], %288 {strides = array<i32>} : memref<8x32xbf16, #tpu.memory_space<vmem>>, vector<8x32xbf16>,
    %290 = arith.index_cast %c7_i32 : i32 to index
    %c0_131 = arith.constant 0 : index
    %c0_132 = arith.constant 0 : index
    %291 = vector.load %arg6[%290, %c0_131, %c0_132] : memref<8x8x32xf32, #tpu.memory_space<vmem>>, vector<1x8x32xf32>
    %292 = vector.shape_cast %291 : vector<1x8x32xf32> to vector<8x32xf32>
    %293 = vector.shape_cast %286 : vector<8x32xf32> to vector<1x8x32xf32>
    tpu.vector_store %arg6[%290, %c0_131, %c0_132], %293 {strides = array<i32>} : memref<8x8x32xf32, #tpu.memory_space<vmem>>, vector<1x8x32xf32>,
    %c8_i32 = arith.constant 8 : i32
    return
  }
  func.func @transform_0(%arg0: i32, %arg1: i32) -> (i32, i32, i32) {
    %c0_i32 = arith.constant 0 : i32
    %c0_i32_0 = arith.constant 0 : i32
    return %arg1, %arg0, %c0_i32 : i32, i32, i32
  }
  func.func @transform_1(%arg0: i32, %arg1: i32) -> (i32, i32) {
    %c0_i32 = arith.constant 0 : i32
    %c0_i32_0 = arith.constant 0 : i32
    %c0_i32_1 = arith.constant 0 : i32
    return %c0_i32, %c0_i32_0 : i32, i32
  }
  func.func @transform_2(%arg0: i32, %arg1: i32) -> (i32, i32) {
    %c0_i32 = arith.constant 0 : i32
    %c0_i32_0 = arith.constant 0 : i32
    %c0_i32_1 = arith.constant 0 : i32
    return %c0_i32, %c0_i32_0 : i32, i32
  }
  func.func @transform_3(%arg0: i32, %arg1: i32) -> (i32, i32) {
    %c0_i32 = arith.constant 0 : i32
    %c0_i32_0 = arith.constant 0 : i32
    %c0_i32_1 = arith.constant 0 : i32
    return %c0_i32, %c0_i32_0 : i32, i32
  }
  func.func @transform_4(%arg0: i32, %arg1: i32) -> (i32, i32, i32) {
    %c0_i32 = arith.constant 0 : i32
    %c0_i32_0 = arith.constant 0 : i32
    return %arg1, %arg0, %c0_i32 : i32, i32, i32
  }
}

module attributes {stable_mosaic.version = 11 : i64} {
  func.func @_lstm_fused_kernel(%arg0: i32, %arg1: i32, %arg2: memref<8x8x32xf32, #tpu.memory_space<vmem>>, %arg3: memref<32x128xbf16, #tpu.memory_space<vmem>>, %arg4: memref<32x128xbf16, #tpu.memory_space<vmem>>, %arg5: memref<1x128xf32, #tpu.memory_space<vmem>>, %arg6: memref<8x8x32xf32, #tpu.memory_space<vmem>>, %arg7: memref<8x8x128xf32, #tpu.memory_space<vmem>>, %arg8: memref<8x32xbf16, #tpu.memory_space<vmem>>, %arg9: memref<8x32xf32, #tpu.memory_space<vmem>>) attributes {dimension_semantics = [#tpu.dimension_semantics<parallel>, #tpu.dimension_semantics<arbitrary>], iteration_bounds = array<i64: 1, 1>, scalar_prefetch = 0 : i64, scratch_operands = 3 : i64, tpu.core_type = #tpu.core_type<tc>, window_params = [{transform_indices = @transform_0, window_bounds = array<i64: 8, 8, 32>}, {pipeline_mode = #tpu.pipeline_mode<synchronous>, transform_indices = @transform_1, window_bounds = array<i64: 32, 128>}, {pipeline_mode = #tpu.pipeline_mode<synchronous>, transform_indices = @transform_2, window_bounds = array<i64: 32, 128>}, {pipeline_mode = #tpu.pipeline_mode<synchronous>, transform_indices = @transform_3, window_bounds = array<i64: 1, 128>}, {transform_indices = @transform_4, window_bounds = array<i64: 8, 8, 32>}]} {
    %c0_i32 = arith.constant 0 : i32
    %0 = arith.cmpi eq, %arg1, %c0_i32 : i32
    %1 = arith.extui %0 : i1 to i32
    %c0_i32_0 = arith.constant 0 : i32
    %2 = arith.cmpi ne, %1, %c0_i32_0 : i32
    scf.if %2 {
      %cst_133 = arith.constant 0.000000e+00 : bf16
      %294 = vector.broadcast %cst_133 : bf16 to vector<8x32xbf16>
      %c0_134 = arith.constant 0 : index
      %c0_135 = arith.constant 0 : index
      %295 = vector.load %arg8[%c0_134, %c0_135] : memref<8x32xbf16, #tpu.memory_space<vmem>>, vector<8x32xbf16>
      tpu.vector_store %arg8[%c0_134, %c0_135], %294 {strides = array<i32>} : memref<8x32xbf16, #tpu.memory_space<vmem>>, vector<8x32xbf16>,
      %cst_136 = arith.constant 0.000000e+00 : f32
      %296 = vector.broadcast %cst_136 : f32 to vector<8x32xf32>
      %c0_137 = arith.constant 0 : index
      %c0_138 = arith.constant 0 : index
      %297 = vector.load %arg9[%c0_137, %c0_138] : memref<8x32xf32, #tpu.memory_space<vmem>>, vector<8x32xf32>
      tpu.vector_store %arg9[%c0_137, %c0_138], %296 {strides = array<i32>} : memref<8x32xf32, #tpu.memory_space<vmem>>, vector<8x32xf32>,
    } else {
    }
    %c0 = arith.constant 0 : index
    %c0_1 = arith.constant 0 : index
    %c0_2 = arith.constant 0 : index
    %3 = vector.load %arg2[%c0, %c0_1, %c0_2] : memref<8x8x32xf32, #tpu.memory_space<vmem>>, vector<8x8x32xf32>
    %4 = vector.shape_cast %3 : vector<8x8x32xf32> to vector<64x32xf32>
    %5 = arith.truncf %4 : vector<64x32xf32> to vector<64x32xbf16>
    %c0_3 = arith.constant 0 : index
    %c0_4 = arith.constant 0 : index
    %6 = vector.load %arg3[%c0_3, %c0_4] : memref<32x128xbf16, #tpu.memory_space<vmem>>, vector<32x128xbf16>
    %cst = arith.constant dense<0.000000e+00> : vector<64x128xf32>
    %7 = tpu.matmul %5, %6, %cst {dimension_numbers = #tpu.dot_dimension_numbers<[1], [0], [0], [1], [0, 0, 1, 1], [], []>} : vector<64x32xbf16>, vector<32x128xbf16>, vector<64x128xf32> -> vector<64x128xf32>
    %c0_5 = arith.constant 0 : index
    %c0_6 = arith.constant 0 : index
    %8 = vector.load %arg5[%c0_5, %c0_6] : memref<1x128xf32, #tpu.memory_space<vmem>>, vector<1x128xf32>
    %9 = vector.broadcast %8 : vector<1x128xf32> to vector<64x128xf32>
    %10 = arith.addf %7, %9 : vector<64x128xf32>
    %11 = vector.shape_cast %10 : vector<64x128xf32> to vector<8x8x128xf32>
    %c0_7 = arith.constant 0 : index
    %c0_8 = arith.constant 0 : index
    %c0_9 = arith.constant 0 : index
    %12 = vector.load %arg7[%c0_7, %c0_8, %c0_9] : memref<8x8x128xf32, #tpu.memory_space<vmem>>, vector<8x8x128xf32>
    tpu.vector_store %arg7[%c0_7, %c0_8, %c0_9], %11 {strides = array<i32>} : memref<8x8x128xf32, #tpu.memory_space<vmem>>, vector<8x8x128xf32>,
    %c0_10 = arith.constant 0 : index
    %c0_11 = arith.constant 0 : index
    %13 = vector.load %arg4[%c0_10, %c0_11] : memref<32x128xbf16, #tpu.memory_space<vmem>>, vector<32x128xbf16>
    %c0_i32_12 = arith.constant 0 : i32
    %14 = arith.index_cast %c0_i32_12 : i32 to index
    %c0_13 = arith.constant 0 : index
    %c0_14 = arith.constant 0 : index
    %15 = vector.load %arg7[%14, %c0_13, %c0_14] : memref<8x8x128xf32, #tpu.memory_space<vmem>>, vector<1x8x128xf32>
    %16 = vector.shape_cast %15 : vector<1x8x128xf32> to vector<8x128xf32>
    %c0_15 = arith.constant 0 : index
    %c0_16 = arith.constant 0 : index
    %17 = vector.load %arg8[%c0_15, %c0_16] : memref<8x32xbf16, #tpu.memory_space<vmem>>, vector<8x32xbf16>
    %cst_17 = arith.constant dense<0.000000e+00> : vector<8x128xf32>
    %18 = tpu.matmul %17, %13, %cst_17 {dimension_numbers = #tpu.dot_dimension_numbers<[1], [0], [0], [1], [0, 0, 1, 1], [], []>} : vector<8x32xbf16>, vector<32x128xbf16>, vector<8x128xf32> -> vector<8x128xf32>
    %19 = arith.addf %16, %18 : vector<8x128xf32>
    %20 = vector.extract_strided_slice %19 {offsets = [0, 0], sizes = [8, 64], strides = [1, 1]} : vector<8x128xf32> to vector<8x64xf32>
    %21 = arith.negf %20 : vector<8x64xf32>
    %22 = math.exp %21 : vector<8x64xf32>
    %cst_18 = arith.constant 1.000000e+00 : f32
    %23 = vector.broadcast %cst_18 : f32 to vector<8x64xf32>
    %24 = arith.addf %23, %22 : vector<8x64xf32>
    %25 = arith.divf %23, %24 : vector<8x64xf32>
    %26 = vector.extract_strided_slice %25 {offsets = [0, 0], sizes = [8, 32], strides = [1, 1]} : vector<8x64xf32> to vector<8x32xf32>
    %27 = vector.extract_strided_slice %25 {offsets = [0, 32], sizes = [8, 32], strides = [1, 1]} : vector<8x64xf32> to vector<8x32xf32>
    %28 = vector.extract_strided_slice %19 {offsets = [0, 64], sizes = [8, 32], strides = [1, 1]} : vector<8x128xf32> to vector<8x32xf32>
    %29 = math.tanh %28 : vector<8x32xf32>
    %30 = vector.extract_strided_slice %19 {offsets = [0, 96], sizes = [8, 32], strides = [1, 1]} : vector<8x128xf32> to vector<8x32xf32>
    %31 = arith.negf %30 : vector<8x32xf32>
    %32 = math.exp %31 : vector<8x32xf32>
    %cst_19 = arith.constant 1.000000e+00 : f32
    %33 = vector.broadcast %cst_19 : f32 to vector<8x32xf32>
    %34 = arith.addf %33, %32 : vector<8x32xf32>
    %35 = arith.divf %33, %34 : vector<8x32xf32>
    %c0_20 = arith.constant 0 : index
    %c0_21 = arith.constant 0 : index
    %36 = vector.load %arg9[%c0_20, %c0_21] : memref<8x32xf32, #tpu.memory_space<vmem>>, vector<8x32xf32>
    %37 = arith.mulf %27, %36 : vector<8x32xf32>
    %38 = arith.mulf %26, %29 : vector<8x32xf32>
    %39 = arith.addf %37, %38 : vector<8x32xf32>
    %40 = math.tanh %39 : vector<8x32xf32>
    %41 = arith.mulf %35, %40 : vector<8x32xf32>
    %c0_22 = arith.constant 0 : index
    %c0_23 = arith.constant 0 : index
    %42 = vector.load %arg9[%c0_22, %c0_23] : memref<8x32xf32, #tpu.memory_space<vmem>>, vector<8x32xf32>
    tpu.vector_store %arg9[%c0_22, %c0_23], %39 {strides = array<i32>} : memref<8x32xf32, #tpu.memory_space<vmem>>, vector<8x32xf32>,
    %43 = arith.truncf %41 : vector<8x32xf32> to vector<8x32xbf16>
    %c0_24 = arith.constant 0 : index
    %c0_25 = arith.constant 0 : index
    %44 = vector.load %arg8[%c0_24, %c0_25] : memref<8x32xbf16, #tpu.memory_space<vmem>>, vector<8x32xbf16>
    tpu.vector_store %arg8[%c0_24, %c0_25], %43 {strides = array<i32>} : memref<8x32xbf16, #tpu.memory_space<vmem>>, vector<8x32xbf16>,
    %45 = arith.index_cast %c0_i32_12 : i32 to index
    %c0_26 = arith.constant 0 : index
    %c0_27 = arith.constant 0 : index
    %46 = vector.load %arg6[%45, %c0_26, %c0_27] : memref<8x8x32xf32, #tpu.memory_space<vmem>>, vector<1x8x32xf32>
    %47 = vector.shape_cast %46 : vector<1x8x32xf32> to vector<8x32xf32>
    %48 = vector.shape_cast %41 : vector<8x32xf32> to vector<1x8x32xf32>
    tpu.vector_store %arg6[%45, %c0_26, %c0_27], %48 {strides = array<i32>} : memref<8x8x32xf32, #tpu.memory_space<vmem>>, vector<1x8x32xf32>,
    %c1_i32 = arith.constant 1 : i32
    %49 = arith.index_cast %c1_i32 : i32 to index
    %c0_28 = arith.constant 0 : index
    %c0_29 = arith.constant 0 : index
    %50 = vector.load %arg7[%49, %c0_28, %c0_29] : memref<8x8x128xf32, #tpu.memory_space<vmem>>, vector<1x8x128xf32>
    %51 = vector.shape_cast %50 : vector<1x8x128xf32> to vector<8x128xf32>
    %c0_30 = arith.constant 0 : index
    %c0_31 = arith.constant 0 : index
    %52 = vector.load %arg8[%c0_30, %c0_31] : memref<8x32xbf16, #tpu.memory_space<vmem>>, vector<8x32xbf16>
    %cst_32 = arith.constant dense<0.000000e+00> : vector<8x128xf32>
    %53 = tpu.matmul %52, %13, %cst_32 {dimension_numbers = #tpu.dot_dimension_numbers<[1], [0], [0], [1], [0, 0, 1, 1], [], []>} : vector<8x32xbf16>, vector<32x128xbf16>, vector<8x128xf32> -> vector<8x128xf32>
    %54 = arith.addf %51, %53 : vector<8x128xf32>
    %55 = vector.extract_strided_slice %54 {offsets = [0, 0], sizes = [8, 64], strides = [1, 1]} : vector<8x128xf32> to vector<8x64xf32>
    %56 = arith.negf %55 : vector<8x64xf32>
    %57 = math.exp %56 : vector<8x64xf32>
    %cst_33 = arith.constant 1.000000e+00 : f32
    %58 = vector.broadcast %cst_33 : f32 to vector<8x64xf32>
    %59 = arith.addf %58, %57 : vector<8x64xf32>
    %60 = arith.divf %58, %59 : vector<8x64xf32>
    %61 = vector.extract_strided_slice %60 {offsets = [0, 0], sizes = [8, 32], strides = [1, 1]} : vector<8x64xf32> to vector<8x32xf32>
    %62 = vector.extract_strided_slice %60 {offsets = [0, 32], sizes = [8, 32], strides = [1, 1]} : vector<8x64xf32> to vector<8x32xf32>
    %63 = vector.extract_strided_slice %54 {offsets = [0, 64], sizes = [8, 32], strides = [1, 1]} : vector<8x128xf32> to vector<8x32xf32>
    %64 = math.tanh %63 : vector<8x32xf32>
    %65 = vector.extract_strided_slice %54 {offsets = [0, 96], sizes = [8, 32], strides = [1, 1]} : vector<8x128xf32> to vector<8x32xf32>
    %66 = arith.negf %65 : vector<8x32xf32>
    %67 = math.exp %66 : vector<8x32xf32>
    %cst_34 = arith.constant 1.000000e+00 : f32
    %68 = vector.broadcast %cst_34 : f32 to vector<8x32xf32>
    %69 = arith.addf %68, %67 : vector<8x32xf32>
    %70 = arith.divf %68, %69 : vector<8x32xf32>
    %c0_35 = arith.constant 0 : index
    %c0_36 = arith.constant 0 : index
    %71 = vector.load %arg9[%c0_35, %c0_36] : memref<8x32xf32, #tpu.memory_space<vmem>>, vector<8x32xf32>
    %72 = arith.mulf %62, %71 : vector<8x32xf32>
    %73 = arith.mulf %61, %64 : vector<8x32xf32>
    %74 = arith.addf %72, %73 : vector<8x32xf32>
    %75 = math.tanh %74 : vector<8x32xf32>
    %76 = arith.mulf %70, %75 : vector<8x32xf32>
    %c0_37 = arith.constant 0 : index
    %c0_38 = arith.constant 0 : index
    %77 = vector.load %arg9[%c0_37, %c0_38] : memref<8x32xf32, #tpu.memory_space<vmem>>, vector<8x32xf32>
    tpu.vector_store %arg9[%c0_37, %c0_38], %74 {strides = array<i32>} : memref<8x32xf32, #tpu.memory_space<vmem>>, vector<8x32xf32>,
    %78 = arith.truncf %76 : vector<8x32xf32> to vector<8x32xbf16>
    %c0_39 = arith.constant 0 : index
    %c0_40 = arith.constant 0 : index
    %79 = vector.load %arg8[%c0_39, %c0_40] : memref<8x32xbf16, #tpu.memory_space<vmem>>, vector<8x32xbf16>
    tpu.vector_store %arg8[%c0_39, %c0_40], %78 {strides = array<i32>} : memref<8x32xbf16, #tpu.memory_space<vmem>>, vector<8x32xbf16>,
    %80 = arith.index_cast %c1_i32 : i32 to index
    %c0_41 = arith.constant 0 : index
    %c0_42 = arith.constant 0 : index
    %81 = vector.load %arg6[%80, %c0_41, %c0_42] : memref<8x8x32xf32, #tpu.memory_space<vmem>>, vector<1x8x32xf32>
    %82 = vector.shape_cast %81 : vector<1x8x32xf32> to vector<8x32xf32>
    %83 = vector.shape_cast %76 : vector<8x32xf32> to vector<1x8x32xf32>
    tpu.vector_store %arg6[%80, %c0_41, %c0_42], %83 {strides = array<i32>} : memref<8x8x32xf32, #tpu.memory_space<vmem>>, vector<1x8x32xf32>,
    %c2_i32 = arith.constant 2 : i32
    %84 = arith.index_cast %c2_i32 : i32 to index
    %c0_43 = arith.constant 0 : index
    %c0_44 = arith.constant 0 : index
    %85 = vector.load %arg7[%84, %c0_43, %c0_44] : memref<8x8x128xf32, #tpu.memory_space<vmem>>, vector<1x8x128xf32>
    %86 = vector.shape_cast %85 : vector<1x8x128xf32> to vector<8x128xf32>
    %c0_45 = arith.constant 0 : index
    %c0_46 = arith.constant 0 : index
    %87 = vector.load %arg8[%c0_45, %c0_46] : memref<8x32xbf16, #tpu.memory_space<vmem>>, vector<8x32xbf16>
    %cst_47 = arith.constant dense<0.000000e+00> : vector<8x128xf32>
    %88 = tpu.matmul %87, %13, %cst_47 {dimension_numbers = #tpu.dot_dimension_numbers<[1], [0], [0], [1], [0, 0, 1, 1], [], []>} : vector<8x32xbf16>, vector<32x128xbf16>, vector<8x128xf32> -> vector<8x128xf32>
    %89 = arith.addf %86, %88 : vector<8x128xf32>
    %90 = vector.extract_strided_slice %89 {offsets = [0, 0], sizes = [8, 64], strides = [1, 1]} : vector<8x128xf32> to vector<8x64xf32>
    %91 = arith.negf %90 : vector<8x64xf32>
    %92 = math.exp %91 : vector<8x64xf32>
    %cst_48 = arith.constant 1.000000e+00 : f32
    %93 = vector.broadcast %cst_48 : f32 to vector<8x64xf32>
    %94 = arith.addf %93, %92 : vector<8x64xf32>
    %95 = arith.divf %93, %94 : vector<8x64xf32>
    %96 = vector.extract_strided_slice %95 {offsets = [0, 0], sizes = [8, 32], strides = [1, 1]} : vector<8x64xf32> to vector<8x32xf32>
    %97 = vector.extract_strided_slice %95 {offsets = [0, 32], sizes = [8, 32], strides = [1, 1]} : vector<8x64xf32> to vector<8x32xf32>
    %98 = vector.extract_strided_slice %89 {offsets = [0, 64], sizes = [8, 32], strides = [1, 1]} : vector<8x128xf32> to vector<8x32xf32>
    %99 = math.tanh %98 : vector<8x32xf32>
    %100 = vector.extract_strided_slice %89 {offsets = [0, 96], sizes = [8, 32], strides = [1, 1]} : vector<8x128xf32> to vector<8x32xf32>
    %101 = arith.negf %100 : vector<8x32xf32>
    %102 = math.exp %101 : vector<8x32xf32>
    %cst_49 = arith.constant 1.000000e+00 : f32
    %103 = vector.broadcast %cst_49 : f32 to vector<8x32xf32>
    %104 = arith.addf %103, %102 : vector<8x32xf32>
    %105 = arith.divf %103, %104 : vector<8x32xf32>
    %c0_50 = arith.constant 0 : index
    %c0_51 = arith.constant 0 : index
    %106 = vector.load %arg9[%c0_50, %c0_51] : memref<8x32xf32, #tpu.memory_space<vmem>>, vector<8x32xf32>
    %107 = arith.mulf %97, %106 : vector<8x32xf32>
    %108 = arith.mulf %96, %99 : vector<8x32xf32>
    %109 = arith.addf %107, %108 : vector<8x32xf32>
    %110 = math.tanh %109 : vector<8x32xf32>
    %111 = arith.mulf %105, %110 : vector<8x32xf32>
    %c0_52 = arith.constant 0 : index
    %c0_53 = arith.constant 0 : index
    %112 = vector.load %arg9[%c0_52, %c0_53] : memref<8x32xf32, #tpu.memory_space<vmem>>, vector<8x32xf32>
    tpu.vector_store %arg9[%c0_52, %c0_53], %109 {strides = array<i32>} : memref<8x32xf32, #tpu.memory_space<vmem>>, vector<8x32xf32>,
    %113 = arith.truncf %111 : vector<8x32xf32> to vector<8x32xbf16>
    %c0_54 = arith.constant 0 : index
    %c0_55 = arith.constant 0 : index
    %114 = vector.load %arg8[%c0_54, %c0_55] : memref<8x32xbf16, #tpu.memory_space<vmem>>, vector<8x32xbf16>
    tpu.vector_store %arg8[%c0_54, %c0_55], %113 {strides = array<i32>} : memref<8x32xbf16, #tpu.memory_space<vmem>>, vector<8x32xbf16>,
    %115 = arith.index_cast %c2_i32 : i32 to index
    %c0_56 = arith.constant 0 : index
    %c0_57 = arith.constant 0 : index
    %116 = vector.load %arg6[%115, %c0_56, %c0_57] : memref<8x8x32xf32, #tpu.memory_space<vmem>>, vector<1x8x32xf32>
    %117 = vector.shape_cast %116 : vector<1x8x32xf32> to vector<8x32xf32>
    %118 = vector.shape_cast %111 : vector<8x32xf32> to vector<1x8x32xf32>
    tpu.vector_store %arg6[%115, %c0_56, %c0_57], %118 {strides = array<i32>} : memref<8x8x32xf32, #tpu.memory_space<vmem>>, vector<1x8x32xf32>,
    %c3_i32 = arith.constant 3 : i32
    %119 = arith.index_cast %c3_i32 : i32 to index
    %c0_58 = arith.constant 0 : index
    %c0_59 = arith.constant 0 : index
    %120 = vector.load %arg7[%119, %c0_58, %c0_59] : memref<8x8x128xf32, #tpu.memory_space<vmem>>, vector<1x8x128xf32>
    %121 = vector.shape_cast %120 : vector<1x8x128xf32> to vector<8x128xf32>
    %c0_60 = arith.constant 0 : index
    %c0_61 = arith.constant 0 : index
    %122 = vector.load %arg8[%c0_60, %c0_61] : memref<8x32xbf16, #tpu.memory_space<vmem>>, vector<8x32xbf16>
    %cst_62 = arith.constant dense<0.000000e+00> : vector<8x128xf32>
    %123 = tpu.matmul %122, %13, %cst_62 {dimension_numbers = #tpu.dot_dimension_numbers<[1], [0], [0], [1], [0, 0, 1, 1], [], []>} : vector<8x32xbf16>, vector<32x128xbf16>, vector<8x128xf32> -> vector<8x128xf32>
    %124 = arith.addf %121, %123 : vector<8x128xf32>
    %125 = vector.extract_strided_slice %124 {offsets = [0, 0], sizes = [8, 64], strides = [1, 1]} : vector<8x128xf32> to vector<8x64xf32>
    %126 = arith.negf %125 : vector<8x64xf32>
    %127 = math.exp %126 : vector<8x64xf32>
    %cst_63 = arith.constant 1.000000e+00 : f32
    %128 = vector.broadcast %cst_63 : f32 to vector<8x64xf32>
    %129 = arith.addf %128, %127 : vector<8x64xf32>
    %130 = arith.divf %128, %129 : vector<8x64xf32>
    %131 = vector.extract_strided_slice %130 {offsets = [0, 0], sizes = [8, 32], strides = [1, 1]} : vector<8x64xf32> to vector<8x32xf32>
    %132 = vector.extract_strided_slice %130 {offsets = [0, 32], sizes = [8, 32], strides = [1, 1]} : vector<8x64xf32> to vector<8x32xf32>
    %133 = vector.extract_strided_slice %124 {offsets = [0, 64], sizes = [8, 32], strides = [1, 1]} : vector<8x128xf32> to vector<8x32xf32>
    %134 = math.tanh %133 : vector<8x32xf32>
    %135 = vector.extract_strided_slice %124 {offsets = [0, 96], sizes = [8, 32], strides = [1, 1]} : vector<8x128xf32> to vector<8x32xf32>
    %136 = arith.negf %135 : vector<8x32xf32>
    %137 = math.exp %136 : vector<8x32xf32>
    %cst_64 = arith.constant 1.000000e+00 : f32
    %138 = vector.broadcast %cst_64 : f32 to vector<8x32xf32>
    %139 = arith.addf %138, %137 : vector<8x32xf32>
    %140 = arith.divf %138, %139 : vector<8x32xf32>
    %c0_65 = arith.constant 0 : index
    %c0_66 = arith.constant 0 : index
    %141 = vector.load %arg9[%c0_65, %c0_66] : memref<8x32xf32, #tpu.memory_space<vmem>>, vector<8x32xf32>
    %142 = arith.mulf %132, %141 : vector<8x32xf32>
    %143 = arith.mulf %131, %134 : vector<8x32xf32>
    %144 = arith.addf %142, %143 : vector<8x32xf32>
    %145 = math.tanh %144 : vector<8x32xf32>
    %146 = arith.mulf %140, %145 : vector<8x32xf32>
    %c0_67 = arith.constant 0 : index
    %c0_68 = arith.constant 0 : index
    %147 = vector.load %arg9[%c0_67, %c0_68] : memref<8x32xf32, #tpu.memory_space<vmem>>, vector<8x32xf32>
    tpu.vector_store %arg9[%c0_67, %c0_68], %144 {strides = array<i32>} : memref<8x32xf32, #tpu.memory_space<vmem>>, vector<8x32xf32>,
    %148 = arith.truncf %146 : vector<8x32xf32> to vector<8x32xbf16>
    %c0_69 = arith.constant 0 : index
    %c0_70 = arith.constant 0 : index
    %149 = vector.load %arg8[%c0_69, %c0_70] : memref<8x32xbf16, #tpu.memory_space<vmem>>, vector<8x32xbf16>
    tpu.vector_store %arg8[%c0_69, %c0_70], %148 {strides = array<i32>} : memref<8x32xbf16, #tpu.memory_space<vmem>>, vector<8x32xbf16>,
    %150 = arith.index_cast %c3_i32 : i32 to index
    %c0_71 = arith.constant 0 : index
    %c0_72 = arith.constant 0 : index
    %151 = vector.load %arg6[%150, %c0_71, %c0_72] : memref<8x8x32xf32, #tpu.memory_space<vmem>>, vector<1x8x32xf32>
    %152 = vector.shape_cast %151 : vector<1x8x32xf32> to vector<8x32xf32>
    %153 = vector.shape_cast %146 : vector<8x32xf32> to vector<1x8x32xf32>
    tpu.vector_store %arg6[%150, %c0_71, %c0_72], %153 {strides = array<i32>} : memref<8x8x32xf32, #tpu.memory_space<vmem>>, vector<1x8x32xf32>,
    %c4_i32 = arith.constant 4 : i32
    %154 = arith.index_cast %c4_i32 : i32 to index
    %c0_73 = arith.constant 0 : index
    %c0_74 = arith.constant 0 : index
    %155 = vector.load %arg7[%154, %c0_73, %c0_74] : memref<8x8x128xf32, #tpu.memory_space<vmem>>, vector<1x8x128xf32>
    %156 = vector.shape_cast %155 : vector<1x8x128xf32> to vector<8x128xf32>
    %c0_75 = arith.constant 0 : index
    %c0_76 = arith.constant 0 : index
    %157 = vector.load %arg8[%c0_75, %c0_76] : memref<8x32xbf16, #tpu.memory_space<vmem>>, vector<8x32xbf16>
    %cst_77 = arith.constant dense<0.000000e+00> : vector<8x128xf32>
    %158 = tpu.matmul %157, %13, %cst_77 {dimension_numbers = #tpu.dot_dimension_numbers<[1], [0], [0], [1], [0, 0, 1, 1], [], []>} : vector<8x32xbf16>, vector<32x128xbf16>, vector<8x128xf32> -> vector<8x128xf32>
    %159 = arith.addf %156, %158 : vector<8x128xf32>
    %160 = vector.extract_strided_slice %159 {offsets = [0, 0], sizes = [8, 64], strides = [1, 1]} : vector<8x128xf32> to vector<8x64xf32>
    %161 = arith.negf %160 : vector<8x64xf32>
    %162 = math.exp %161 : vector<8x64xf32>
    %cst_78 = arith.constant 1.000000e+00 : f32
    %163 = vector.broadcast %cst_78 : f32 to vector<8x64xf32>
    %164 = arith.addf %163, %162 : vector<8x64xf32>
    %165 = arith.divf %163, %164 : vector<8x64xf32>
    %166 = vector.extract_strided_slice %165 {offsets = [0, 0], sizes = [8, 32], strides = [1, 1]} : vector<8x64xf32> to vector<8x32xf32>
    %167 = vector.extract_strided_slice %165 {offsets = [0, 32], sizes = [8, 32], strides = [1, 1]} : vector<8x64xf32> to vector<8x32xf32>
    %168 = vector.extract_strided_slice %159 {offsets = [0, 64], sizes = [8, 32], strides = [1, 1]} : vector<8x128xf32> to vector<8x32xf32>
    %169 = math.tanh %168 : vector<8x32xf32>
    %170 = vector.extract_strided_slice %159 {offsets = [0, 96], sizes = [8, 32], strides = [1, 1]} : vector<8x128xf32> to vector<8x32xf32>
    %171 = arith.negf %170 : vector<8x32xf32>
    %172 = math.exp %171 : vector<8x32xf32>
    %cst_79 = arith.constant 1.000000e+00 : f32
    %173 = vector.broadcast %cst_79 : f32 to vector<8x32xf32>
    %174 = arith.addf %173, %172 : vector<8x32xf32>
    %175 = arith.divf %173, %174 : vector<8x32xf32>
    %c0_80 = arith.constant 0 : index
    %c0_81 = arith.constant 0 : index
    %176 = vector.load %arg9[%c0_80, %c0_81] : memref<8x32xf32, #tpu.memory_space<vmem>>, vector<8x32xf32>
    %177 = arith.mulf %167, %176 : vector<8x32xf32>
    %178 = arith.mulf %166, %169 : vector<8x32xf32>
    %179 = arith.addf %177, %178 : vector<8x32xf32>
    %180 = math.tanh %179 : vector<8x32xf32>
    %181 = arith.mulf %175, %180 : vector<8x32xf32>
    %c0_82 = arith.constant 0 : index
    %c0_83 = arith.constant 0 : index
    %182 = vector.load %arg9[%c0_82, %c0_83] : memref<8x32xf32, #tpu.memory_space<vmem>>, vector<8x32xf32>
    tpu.vector_store %arg9[%c0_82, %c0_83], %179 {strides = array<i32>} : memref<8x32xf32, #tpu.memory_space<vmem>>, vector<8x32xf32>,
    %183 = arith.truncf %181 : vector<8x32xf32> to vector<8x32xbf16>
    %c0_84 = arith.constant 0 : index
    %c0_85 = arith.constant 0 : index
    %184 = vector.load %arg8[%c0_84, %c0_85] : memref<8x32xbf16, #tpu.memory_space<vmem>>, vector<8x32xbf16>
    tpu.vector_store %arg8[%c0_84, %c0_85], %183 {strides = array<i32>} : memref<8x32xbf16, #tpu.memory_space<vmem>>, vector<8x32xbf16>,
    %185 = arith.index_cast %c4_i32 : i32 to index
    %c0_86 = arith.constant 0 : index
    %c0_87 = arith.constant 0 : index
    %186 = vector.load %arg6[%185, %c0_86, %c0_87] : memref<8x8x32xf32, #tpu.memory_space<vmem>>, vector<1x8x32xf32>
    %187 = vector.shape_cast %186 : vector<1x8x32xf32> to vector<8x32xf32>
    %188 = vector.shape_cast %181 : vector<8x32xf32> to vector<1x8x32xf32>
    tpu.vector_store %arg6[%185, %c0_86, %c0_87], %188 {strides = array<i32>} : memref<8x8x32xf32, #tpu.memory_space<vmem>>, vector<1x8x32xf32>,
    %c5_i32 = arith.constant 5 : i32
    %189 = arith.index_cast %c5_i32 : i32 to index
    %c0_88 = arith.constant 0 : index
    %c0_89 = arith.constant 0 : index
    %190 = vector.load %arg7[%189, %c0_88, %c0_89] : memref<8x8x128xf32, #tpu.memory_space<vmem>>, vector<1x8x128xf32>
    %191 = vector.shape_cast %190 : vector<1x8x128xf32> to vector<8x128xf32>
    %c0_90 = arith.constant 0 : index
    %c0_91 = arith.constant 0 : index
    %192 = vector.load %arg8[%c0_90, %c0_91] : memref<8x32xbf16, #tpu.memory_space<vmem>>, vector<8x32xbf16>
    %cst_92 = arith.constant dense<0.000000e+00> : vector<8x128xf32>
    %193 = tpu.matmul %192, %13, %cst_92 {dimension_numbers = #tpu.dot_dimension_numbers<[1], [0], [0], [1], [0, 0, 1, 1], [], []>} : vector<8x32xbf16>, vector<32x128xbf16>, vector<8x128xf32> -> vector<8x128xf32>
    %194 = arith.addf %191, %193 : vector<8x128xf32>
    %195 = vector.extract_strided_slice %194 {offsets = [0, 0], sizes = [8, 64], strides = [1, 1]} : vector<8x128xf32> to vector<8x64xf32>
    %196 = arith.negf %195 : vector<8x64xf32>
    %197 = math.exp %196 : vector<8x64xf32>
    %cst_93 = arith.constant 1.000000e+00 : f32
    %198 = vector.broadcast %cst_93 : f32 to vector<8x64xf32>
    %199 = arith.addf %198, %197 : vector<8x64xf32>
    %200 = arith.divf %198, %199 : vector<8x64xf32>
    %201 = vector.extract_strided_slice %200 {offsets = [0, 0], sizes = [8, 32], strides = [1, 1]} : vector<8x64xf32> to vector<8x32xf32>
    %202 = vector.extract_strided_slice %200 {offsets = [0, 32], sizes = [8, 32], strides = [1, 1]} : vector<8x64xf32> to vector<8x32xf32>
    %203 = vector.extract_strided_slice %194 {offsets = [0, 64], sizes = [8, 32], strides = [1, 1]} : vector<8x128xf32> to vector<8x32xf32>
    %204 = math.tanh %203 : vector<8x32xf32>
    %205 = vector.extract_strided_slice %194 {offsets = [0, 96], sizes = [8, 32], strides = [1, 1]} : vector<8x128xf32> to vector<8x32xf32>
    %206 = arith.negf %205 : vector<8x32xf32>
    %207 = math.exp %206 : vector<8x32xf32>
    %cst_94 = arith.constant 1.000000e+00 : f32
    %208 = vector.broadcast %cst_94 : f32 to vector<8x32xf32>
    %209 = arith.addf %208, %207 : vector<8x32xf32>
    %210 = arith.divf %208, %209 : vector<8x32xf32>
    %c0_95 = arith.constant 0 : index
    %c0_96 = arith.constant 0 : index
    %211 = vector.load %arg9[%c0_95, %c0_96] : memref<8x32xf32, #tpu.memory_space<vmem>>, vector<8x32xf32>
    %212 = arith.mulf %202, %211 : vector<8x32xf32>
    %213 = arith.mulf %201, %204 : vector<8x32xf32>
    %214 = arith.addf %212, %213 : vector<8x32xf32>
    %215 = math.tanh %214 : vector<8x32xf32>
    %216 = arith.mulf %210, %215 : vector<8x32xf32>
    %c0_97 = arith.constant 0 : index
    %c0_98 = arith.constant 0 : index
    %217 = vector.load %arg9[%c0_97, %c0_98] : memref<8x32xf32, #tpu.memory_space<vmem>>, vector<8x32xf32>
    tpu.vector_store %arg9[%c0_97, %c0_98], %214 {strides = array<i32>} : memref<8x32xf32, #tpu.memory_space<vmem>>, vector<8x32xf32>,
    %218 = arith.truncf %216 : vector<8x32xf32> to vector<8x32xbf16>
    %c0_99 = arith.constant 0 : index
    %c0_100 = arith.constant 0 : index
    %219 = vector.load %arg8[%c0_99, %c0_100] : memref<8x32xbf16, #tpu.memory_space<vmem>>, vector<8x32xbf16>
    tpu.vector_store %arg8[%c0_99, %c0_100], %218 {strides = array<i32>} : memref<8x32xbf16, #tpu.memory_space<vmem>>, vector<8x32xbf16>,
    %220 = arith.index_cast %c5_i32 : i32 to index
    %c0_101 = arith.constant 0 : index
    %c0_102 = arith.constant 0 : index
    %221 = vector.load %arg6[%220, %c0_101, %c0_102] : memref<8x8x32xf32, #tpu.memory_space<vmem>>, vector<1x8x32xf32>
    %222 = vector.shape_cast %221 : vector<1x8x32xf32> to vector<8x32xf32>
    %223 = vector.shape_cast %216 : vector<8x32xf32> to vector<1x8x32xf32>
    tpu.vector_store %arg6[%220, %c0_101, %c0_102], %223 {strides = array<i32>} : memref<8x8x32xf32, #tpu.memory_space<vmem>>, vector<1x8x32xf32>,
    %c6_i32 = arith.constant 6 : i32
    %224 = arith.index_cast %c6_i32 : i32 to index
    %c0_103 = arith.constant 0 : index
    %c0_104 = arith.constant 0 : index
    %225 = vector.load %arg7[%224, %c0_103, %c0_104] : memref<8x8x128xf32, #tpu.memory_space<vmem>>, vector<1x8x128xf32>
    %226 = vector.shape_cast %225 : vector<1x8x128xf32> to vector<8x128xf32>
    %c0_105 = arith.constant 0 : index
    %c0_106 = arith.constant 0 : index
    %227 = vector.load %arg8[%c0_105, %c0_106] : memref<8x32xbf16, #tpu.memory_space<vmem>>, vector<8x32xbf16>
    %cst_107 = arith.constant dense<0.000000e+00> : vector<8x128xf32>
    %228 = tpu.matmul %227, %13, %cst_107 {dimension_numbers = #tpu.dot_dimension_numbers<[1], [0], [0], [1], [0, 0, 1, 1], [], []>} : vector<8x32xbf16>, vector<32x128xbf16>, vector<8x128xf32> -> vector<8x128xf32>
    %229 = arith.addf %226, %228 : vector<8x128xf32>
    %230 = vector.extract_strided_slice %229 {offsets = [0, 0], sizes = [8, 64], strides = [1, 1]} : vector<8x128xf32> to vector<8x64xf32>
    %231 = arith.negf %230 : vector<8x64xf32>
    %232 = math.exp %231 : vector<8x64xf32>
    %cst_108 = arith.constant 1.000000e+00 : f32
    %233 = vector.broadcast %cst_108 : f32 to vector<8x64xf32>
    %234 = arith.addf %233, %232 : vector<8x64xf32>
    %235 = arith.divf %233, %234 : vector<8x64xf32>
    %236 = vector.extract_strided_slice %235 {offsets = [0, 0], sizes = [8, 32], strides = [1, 1]} : vector<8x64xf32> to vector<8x32xf32>
    %237 = vector.extract_strided_slice %235 {offsets = [0, 32], sizes = [8, 32], strides = [1, 1]} : vector<8x64xf32> to vector<8x32xf32>
    %238 = vector.extract_strided_slice %229 {offsets = [0, 64], sizes = [8, 32], strides = [1, 1]} : vector<8x128xf32> to vector<8x32xf32>
    %239 = math.tanh %238 : vector<8x32xf32>
    %240 = vector.extract_strided_slice %229 {offsets = [0, 96], sizes = [8, 32], strides = [1, 1]} : vector<8x128xf32> to vector<8x32xf32>
    %241 = arith.negf %240 : vector<8x32xf32>
    %242 = math.exp %241 : vector<8x32xf32>
    %cst_109 = arith.constant 1.000000e+00 : f32
    %243 = vector.broadcast %cst_109 : f32 to vector<8x32xf32>
    %244 = arith.addf %243, %242 : vector<8x32xf32>
    %245 = arith.divf %243, %244 : vector<8x32xf32>
    %c0_110 = arith.constant 0 : index
    %c0_111 = arith.constant 0 : index
    %246 = vector.load %arg9[%c0_110, %c0_111] : memref<8x32xf32, #tpu.memory_space<vmem>>, vector<8x32xf32>
    %247 = arith.mulf %237, %246 : vector<8x32xf32>
    %248 = arith.mulf %236, %239 : vector<8x32xf32>
    %249 = arith.addf %247, %248 : vector<8x32xf32>
    %250 = math.tanh %249 : vector<8x32xf32>
    %251 = arith.mulf %245, %250 : vector<8x32xf32>
    %c0_112 = arith.constant 0 : index
    %c0_113 = arith.constant 0 : index
    %252 = vector.load %arg9[%c0_112, %c0_113] : memref<8x32xf32, #tpu.memory_space<vmem>>, vector<8x32xf32>
    tpu.vector_store %arg9[%c0_112, %c0_113], %249 {strides = array<i32>} : memref<8x32xf32, #tpu.memory_space<vmem>>, vector<8x32xf32>,
    %253 = arith.truncf %251 : vector<8x32xf32> to vector<8x32xbf16>
    %c0_114 = arith.constant 0 : index
    %c0_115 = arith.constant 0 : index
    %254 = vector.load %arg8[%c0_114, %c0_115] : memref<8x32xbf16, #tpu.memory_space<vmem>>, vector<8x32xbf16>
    tpu.vector_store %arg8[%c0_114, %c0_115], %253 {strides = array<i32>} : memref<8x32xbf16, #tpu.memory_space<vmem>>, vector<8x32xbf16>,
    %255 = arith.index_cast %c6_i32 : i32 to index
    %c0_116 = arith.constant 0 : index
    %c0_117 = arith.constant 0 : index
    %256 = vector.load %arg6[%255, %c0_116, %c0_117] : memref<8x8x32xf32, #tpu.memory_space<vmem>>, vector<1x8x32xf32>
    %257 = vector.shape_cast %256 : vector<1x8x32xf32> to vector<8x32xf32>
    %258 = vector.shape_cast %251 : vector<8x32xf32> to vector<1x8x32xf32>
    tpu.vector_store %arg6[%255, %c0_116, %c0_117], %258 {strides = array<i32>} : memref<8x8x32xf32, #tpu.memory_space<vmem>>, vector<1x8x32xf32>,
    %c7_i32 = arith.constant 7 : i32
    %259 = arith.index_cast %c7_i32 : i32 to index
    %c0_118 = arith.constant 0 : index
    %c0_119 = arith.constant 0 : index
    %260 = vector.load %arg7[%259, %c0_118, %c0_119] : memref<8x8x128xf32, #tpu.memory_space<vmem>>, vector<1x8x128xf32>
    %261 = vector.shape_cast %260 : vector<1x8x128xf32> to vector<8x128xf32>
    %c0_120 = arith.constant 0 : index
    %c0_121 = arith.constant 0 : index
    %262 = vector.load %arg8[%c0_120, %c0_121] : memref<8x32xbf16, #tpu.memory_space<vmem>>, vector<8x32xbf16>
    %cst_122 = arith.constant dense<0.000000e+00> : vector<8x128xf32>
    %263 = tpu.matmul %262, %13, %cst_122 {dimension_numbers = #tpu.dot_dimension_numbers<[1], [0], [0], [1], [0, 0, 1, 1], [], []>} : vector<8x32xbf16>, vector<32x128xbf16>, vector<8x128xf32> -> vector<8x128xf32>
    %264 = arith.addf %261, %263 : vector<8x128xf32>
    %265 = vector.extract_strided_slice %264 {offsets = [0, 0], sizes = [8, 64], strides = [1, 1]} : vector<8x128xf32> to vector<8x64xf32>
    %266 = arith.negf %265 : vector<8x64xf32>
    %267 = math.exp %266 : vector<8x64xf32>
    %cst_123 = arith.constant 1.000000e+00 : f32
    %268 = vector.broadcast %cst_123 : f32 to vector<8x64xf32>
    %269 = arith.addf %268, %267 : vector<8x64xf32>
    %270 = arith.divf %268, %269 : vector<8x64xf32>
    %271 = vector.extract_strided_slice %270 {offsets = [0, 0], sizes = [8, 32], strides = [1, 1]} : vector<8x64xf32> to vector<8x32xf32>
    %272 = vector.extract_strided_slice %270 {offsets = [0, 32], sizes = [8, 32], strides = [1, 1]} : vector<8x64xf32> to vector<8x32xf32>
    %273 = vector.extract_strided_slice %264 {offsets = [0, 64], sizes = [8, 32], strides = [1, 1]} : vector<8x128xf32> to vector<8x32xf32>
    %274 = math.tanh %273 : vector<8x32xf32>
    %275 = vector.extract_strided_slice %264 {offsets = [0, 96], sizes = [8, 32], strides = [1, 1]} : vector<8x128xf32> to vector<8x32xf32>
    %276 = arith.negf %275 : vector<8x32xf32>
    %277 = math.exp %276 : vector<8x32xf32>
    %cst_124 = arith.constant 1.000000e+00 : f32
    %278 = vector.broadcast %cst_124 : f32 to vector<8x32xf32>
    %279 = arith.addf %278, %277 : vector<8x32xf32>
    %280 = arith.divf %278, %279 : vector<8x32xf32>
    %c0_125 = arith.constant 0 : index
    %c0_126 = arith.constant 0 : index
    %281 = vector.load %arg9[%c0_125, %c0_126] : memref<8x32xf32, #tpu.memory_space<vmem>>, vector<8x32xf32>
    %282 = arith.mulf %272, %281 : vector<8x32xf32>
    %283 = arith.mulf %271, %274 : vector<8x32xf32>
    %284 = arith.addf %282, %283 : vector<8x32xf32>
    %285 = math.tanh %284 : vector<8x32xf32>
    %286 = arith.mulf %280, %285 : vector<8x32xf32>
    %c0_127 = arith.constant 0 : index
    %c0_128 = arith.constant 0 : index
    %287 = vector.load %arg9[%c0_127, %c0_128] : memref<8x32xf32, #tpu.memory_space<vmem>>, vector<8x32xf32>
    tpu.vector_store %arg9[%c0_127, %c0_128], %284 {strides = array<i32>} : memref<8x32xf32, #tpu.memory_space<vmem>>, vector<8x32xf32>,
    %288 = arith.truncf %286 : vector<8x32xf32> to vector<8x32xbf16>
    %c0_129 = arith.constant 0 : index
    %c0_130 = arith.constant 0 : index
    %289 = vector.load %arg8[%c0_129, %c0_130] : memref<8x32xbf16, #tpu.memory_space<vmem>>, vector<8x32xbf16>
    tpu.vector_store %arg8[%c0_129, %c0_130], %288 {strides = array<i32>} : memref<8x32xbf16, #tpu.memory_space<vmem>>, vector<8x32xbf16>,
    %290 = arith.index_cast %c7_i32 : i32 to index
    %c0_131 = arith.constant 0 : index
    %c0_132 = arith.constant 0 : index
    %291 = vector.load %arg6[%290, %c0_131, %c0_132] : memref<8x8x32xf32, #tpu.memory_space<vmem>>, vector<1x8x32xf32>
    %292 = vector.shape_cast %291 : vector<1x8x32xf32> to vector<8x32xf32>
    %293 = vector.shape_cast %286 : vector<8x32xf32> to vector<1x8x32xf32>
    tpu.vector_store %arg6[%290, %c0_131, %c0_132], %293 {strides = array<i32>} : memref<8x8x32xf32, #tpu.memory_space<vmem>>, vector<1x8x32xf32>,
    %c8_i32 = arith.constant 8 : i32
    return
  }
  func.func @transform_0(%arg0: i32, %arg1: i32) -> (i32, i32, i32) {
    %c0_i32 = arith.constant 0 : i32
    %c0_i32_0 = arith.constant 0 : i32
    return %arg1, %arg0, %c0_i32 : i32, i32, i32
  }
  func.func @transform_1(%arg0: i32, %arg1: i32) -> (i32, i32) {
    %c0_i32 = arith.constant 0 : i32
    %c0_i32_0 = arith.constant 0 : i32
    %c0_i32_1 = arith.constant 0 : i32
    return %c0_i32, %c0_i32_0 : i32, i32
  }
  func.func @transform_2(%arg0: i32, %arg1: i32) -> (i32, i32) {
    %c0_i32 = arith.constant 0 : i32
    %c0_i32_0 = arith.constant 0 : i32
    %c0_i32_1 = arith.constant 0 : i32
    return %c0_i32, %c0_i32_0 : i32, i32
  }
  func.func @transform_3(%arg0: i32, %arg1: i32) -> (i32, i32) {
    %c0_i32 = arith.constant 0 : i32
    %c0_i32_0 = arith.constant 0 : i32
    %c0_i32_1 = arith.constant 0 : i32
    return %c0_i32, %c0_i32_0 : i32, i32
  }
  func.func @transform_4(%arg0: i32, %arg1: i32) -> (i32, i32, i32) {
    %c0_i32 = arith.constant 0 : i32
    %c0_i32_0 = arith.constant 0 : i32
    return %arg1, %arg0, %c0_i32 : i32, i32, i32
  }
}

</mosaic_0001>

<bundles_post_ra>
// kernel: lstm_model_forward.5
= control target key start
LH: loop header
LB: loop body
LE: loop exit
PB: predicated region body
PF: predicated region fallthrough
CT: control target
= control target key end

     0   :  { %vm50_vm0 = vcmask 261120   ;;  %s252_s1 = inlined_call_operand.vmem [shape: bf16[32,128], index: 1, kind: input, shape index: {}]   ;;  %s253_s0 = inlined_call_operand.vmem [shape: f32[64,32], index: 0, kind: input, shape index: {}]   ;;  %s254_s2 = inlined_call_operand.vmem [shape: f32[1,128], index: 2, kind: input, shape index: {}]   ;;  %s255_s3 = inlined_call_operand.vmem [shape: f32[64,128], index: 3, kind: output, shape index: {}]  }
   0x1   :  { %v169_v0 = vld [vmem:[%s252_s1 + $0x8] sm:$0xff]   ;;  %v170_v1 = vld [vmem:[%s252_s1] sm:$0xff]   ;;  %v17_v7 = vld [vmem:[%s253_s0 + $0x10] sm:$0xff] }
   0x2   :  { %153 = vmatprep.subr.bf16.mxu0 %v169_v0  ;;  %165 = vmatprep.subr.bf16.mxu1 %v169_v0  ;;  %v15_v2 = vld [vmem:[%s253_s0] sm:$0xff]  ;;  %v16_v3 = vld [vmem:[%s253_s0 + $0x8] sm:$0xff]  ;;  %v18_v8 = vld [vmem:[%s253_s0 + $0x18] sm:$0xff] }
   0x3   :  { %v19_v4 = vld [vmem:[%s253_s0 + $0x20] sm:$0xff]  ;;  %154 = vmatpush3.bf16.msra.mxu0 %v169_v0  ;;  %167 = vmatpush3.bf16.msra.mxu1 %v169_v0  ;;  %v23_v5 = vpack.c.bf16 %v16_v3, %v15_v2  ;;  %v20_v6 = vld [vmem:[%s253_s0 + $0x28] sm:$0xff]  ;;  %v21_v10 = vld [vmem:[%s253_s0 + $0x30] sm:$0xff]  ;;  %v24_v12 = vpack.c.bf16 %v18_v8, %v17_v7 }
   0x4   :  { %155 = vmatprep.subr.bf16.mxu0 %v170_v1  ;;  %166 = vmatprep.subr.bf16.mxu1 %v170_v1  ;;  %v25_v9 = vpack.c.bf16 %v20_v6, %v19_v4  ;;  %v22_v11 = vld [vmem:[%s253_s0 + $0x38] sm:$0xff]  ;;  %v140_v14 = vld [vmem:[%s254_s2] ss:$0 sm:$0xff] }
   0x5   :  { %157 = vmatprep.mubr.msk.bf16.mxu0 %vm50_vm0, %v23_v5  ;;  %v26_v13 = vpack.c.bf16 %v22_v11, %v21_v10 }
   0x6   :  { %161 = vmatprep.mubr.msk.bf16.mxu1 %vm50_vm0, %v25_v9 }
   0x7   :  { %156 = vmatpush3.bf16.msra.mxu0 %v170_v1  ;;  %168 = vmatpush3.bf16.msra.mxu1 %v170_v1 }
   0xa   :  { %158 = vmatmul.mubr.msk.bf16.vlgmr.msra.gmra.mxu0 %vm50_vm0, %v24_v12  ;;  %162 = vmatmul.mubr.msk.bf16.vlgmr.msra.gmra.mxu1 %vm50_vm0, %v26_v13 }
  0xca   :  { %v159_v15 = vpop.f32.mrf.mxu0  ;;  %v163_v16 = vpop.f32.mrf.mxu1 }
  0xcb   :  { %v106_v17 = vadd.f32 %v159_v15, %v140_v14  ;;  %v122_v18 = vadd.f32 %v163_v16, %v140_v14 }
  0xcc   :  { %v97_v19 = vpop.f32.mrf.mxu0  ;;  %v113_v20 = vpop.f32.mrf.mxu1 }
  0xcd   :  { %130 = vst [vmem:[%s255_s3 + $0x10] sm:$0xff] %v106_v17  ;;  %134 = vst [vmem:[%s255_s3 + $0x30] sm:$0xff] %v122_v18  ;;  %v98_v21 = vadd.f32 %v140_v14, %v97_v19  ;;  %v114_v22 = vadd.f32 %v140_v14, %v113_v20 }
  0xce   :  { %v160_v23 = vpop.f32.mrf.mxu0  ;;  %v164_v24 = vpop.f32.mrf.mxu1 }
  0xcf   :  { %128 = vst [vmem:[%s255_s3] sm:$0xff] %v98_v21  ;;  %132 = vst [vmem:[%s255_s3 + $0x20] sm:$0xff] %v114_v22  ;;  %v109_v25 = vadd.f32 %v160_v23, %v140_v14  ;;  %v125_v26 = vadd.f32 %v164_v24, %v140_v14 }
  0xd0   :  { %v100_v27 = vpop.f32.mrf.mxu0  ;;  %v116_v28 = vpop.f32.mrf.mxu1 }
  0xd1   :  { %131 = vst [vmem:[%s255_s3 + $0x18] sm:$0xff] %v109_v25  ;;  %135 = vst [vmem:[%s255_s3 + $0x38] sm:$0xff] %v125_v26  ;;  %v101_v29 = vadd.f32 %v140_v14, %v100_v27  ;;  %v117_v30 = vadd.f32 %v140_v14, %v116_v28 }
  0xd3   :  { %129 = vst [vmem:[%s255_s3 + $0x8] sm:$0xff] %v101_v29  ;;  %133 = vst [vmem:[%s255_s3 + $0x28] sm:$0xff] %v117_v30 }

// kernel: lstm_model_forward.4
= control target key start
LH: loop header
LB: loop body
LE: loop exit
PB: predicated region body
PF: predicated region fallthrough
CT: control target
= control target key end

     0   :  { %vm24_vm0 = vcmask 261120   ;;  %vm22_vm1 = vcmask 257024   ;;  %v1154_v0 = vmov 0.0   ;;  %vm1155_vm2 = vmmov 0   ;;  %s1157_s5 = smov 64   ;;  %s1158_s6 = smov 32   ;;  %s1453_s1 = inlined_call_operand.vmem [shape: bf16[32,128], index: 1, kind: input, shape index: {}]   ;;  %s1454_s2 = inlined_call_operand.vmem [shape: bf16[32,128], index: 2, kind: input, shape index: {}]   ;;  %s1455_s0 = inlined_call_operand.vmem [shape: f32[8,8,32], index: 0, kind: input, shape index: {}]   ;;  %s1456_s3 = inlined_call_operand.vmem [shape: f32[1,128], index: 3, kind: input, shape index: {}]   ;;  %s1457_s4 = inlined_call_operand.vmem [shape: f32[8,8,32], index: 4, kind: output, shape index: {}]  }
   0x1   :  { %1016 = vmatprep.subr.bf16.mxu1 %v1154_v0  ;;  %v1086_v1 = vld [vmem:[%s1453_s1 + $0x8] sm:$0xff]   ;;  %1020 = vmatprep.mubr.msk.bf16.mxu1 %vm1155_vm2, %v1154_v0  ;;  %25 = vst.msk [vmem:[#allocation4] sm:$0xff] %vm24_vm0, %v1154_v0  ;;  %v1156_v3 = vmov 0   ;;  %v1088_v4 = vld [vmem:[%s1453_s1] sm:$0xff]   ;;  %v28_v8 = vld [vmem:[%s1455_s0 + $0x10] sm:$0xff] }
   0x2   :  { %v1196_v2 = vld [vmem:[%s1454_s2 + $0x8] sm:$0xff]   ;;  %23 = vst.msk [vmem:[#allocation3] sm:$0xf] %vm22_vm1, %v1156_v3  ;;  %1004 = vmatprep.subr.bf16.mxu0 %v1086_v1  ;;  %v1206_v5 = vld [vmem:[%s1454_s2] sm:$0xff]   ;;  %v29_v10 = vld [vmem:[%s1455_s0 + $0x18] sm:$0xff] }
   0x3   :  { %1017 = vmatpush3.bf16.msra.mxu1 %v1196_v2  ;;  %1005 = vmatpush3.bf16.msra.mxu0 %v1086_v1  ;;  %v26_v6 = vld [vmem:[%s1455_s0] sm:$0xff]  ;;  %v27_v7 = vld [vmem:[%s1455_s0 + $0x8] sm:$0xff]  ;;  %v35_v11 = vpack.c.bf16 %v29_v10, %v28_v8  ;;  %v32_v1 = vld [vmem:[%s1455_s0 + $0x30] sm:$0xff] }
   0x4   :  { %1018 = vmatprep.subr.bf16.mxu1 %v1154_v0  ;;  %1006 = vmatprep.subr.bf16.mxu0 %v1088_v4  ;;  %v34_v9 = vpack.c.bf16 %v27_v7, %v26_v6  ;;  %v1242_v15 = vld [vmem:[%s1456_s3] ss:$0 sm:$0xff]  ;;  %s1159_s3 = smov 96   ;;  %v31_v63 = vld [vmem:[%s1455_s0 + $0x28] sm:$0xff] }
   0x5   :  { %v30_v62 = vld [vmem:[%s1455_s0 + $0x20] sm:$0xff] }
   0x6   :  { %1008 = vmatprep.mubr.msk.bf16.mxu0 %vm24_vm0, %v34_v9  ;;  %v36_v3 = vpack.c.bf16 %v31_v63, %v30_v62 }
   0x7   :  { %1019 = vmatpush3.bf16.msra.mxu1 %v1206_v5  ;;  %1007 = vmatpush3.bf16.msra.mxu0 %v1088_v4  ;;  %v33_v4 = vld [vmem:[%s1455_s0 + $0x38] sm:$0xff] }
   0x8   :  { %1024 = vmatprep.subr.bf16.mxu1 %v1154_v0  ;;  %1032 = vmatprep.subr.bf16.mxu0 %v1154_v0  ;;  %v216_v23 = vld [vmem:[#allocation4] sm:$0xff]  ;;  %v37_v6 = vpack.c.bf16 %v33_v4, %v32_v1 }
   0x9   :  { %v152_v12 = vld [vmem:[#allocation3] sm:$0xf] }
   0xa   :  { %1021 = vmatmul.mubr.msk.bf16.vlgmr.msra.gmra.mxu1 %vm24_vm0, %v152_v12  ;;  %1009 = vmatmul.mubr.msk.bf16.vlgmr.msra.gmra.mxu0 %vm24_vm0, %v35_v11 }
   0xb   :  { %1025 = vmatpush3.bf16.msra.mxu1 %v1196_v2  ;;  %1028 = vmatprep.mubr.msk.bf16.mxu1 %vm1155_vm2, %v1154_v0 }
   0xc   :  { %1026 = vmatprep.subr.bf16.mxu1 %v1154_v0  ;;  %1033 = vmatpush3.bf16.msra.mxu0 %v1196_v2 }
   0xd   :  { %1034 = vmatprep.subr.bf16.mxu0 %v1154_v0  ;;  %1012 = vmatprep.mubr.msk.bf16.mxu0 %vm24_vm0, %v36_v3 }
   0xf   :  { %1027 = vmatpush3.bf16.msra.mxu1 %v1206_v5 }
  0x10   :  { %1035 = vmatpush3.bf16.msra.mxu0 %v1206_v5  ;;  %1040 = vmatprep.subr.bf16.mxu1 %v1154_v0 }
  0x11   :  { %1048 = vmatprep.subr.bf16.mxu0 %v1154_v0 }
  0x12   :  { %1013 = vmatmul.mubr.msk.bf16.gmra.mxu0 %vm24_vm0, %v37_v6 }
  0x13   :  { %1036 = vmatprep.mubr.msk.bf16.mxu0 %vm1155_vm2, %v1154_v0 }
  0xca   :  { %v202_v13 = vpop.f32.mrf.mxu1  ;;  %v1237_v14 = vpop.f32.mrf.mxu0 }
  0xcc   :  { %v1022_v16 = vpop.f32.mrf.mxu1  ;;  %v108_v17 = vpop.f32.mrf.mxu0 }
  0xcd   :  { %v109_v18 = vadd.f32 %v1242_v15, %v108_v17 }
  0xce   :  { %v205_v19 = vpop.f32.mrf.mxu1  ;;  %v1265_v42 = vpop.f32.mrf.mxu0 }
  0xcf   :  { %v208_v20 = vadd.f32 %v202_v13, %v109_v18 }
  0xd0   :  { %v1023_v21 = vpop.f32.mrf.mxu1  ;;  %v111_v43 = vpop.f32.mrf.mxu0 }
  0xd1   :  { %1090 = vtanh.f32 %v208_v20  ;;  %v936_v24 = vmul.f32 -1.442695, %v208_v20  ;;  %v112_v44 = vadd.f32 %v1242_v15, %v111_v43  ;;  %v117_v20 = vadd.f32 %v1237_v14, %v1242_v15 }
  0xd2   :  { %v1303_v16 = vpop.f32.mrf.mxu0 }
  0xd3   :  { %1092 = vpow2.f32 %v936_v24 }
  0xd4   :  { %v1305_v17 = vpop.f32.mrf.mxu0 }
  0xd6   :  { %v1307_v18 = vpop.f32.mrf.mxu0 }
  0xd8   :  { %v1309_v19 = vpop.f32.mrf.mxu0 }
  0xde   :  { %v1091_v22 = vpop.eup %1090 }
  0xdf   :  { %223 = vrot.lane.b32.xlu0 %v1091_v22, %s1157_s5 }
  0xe0   :  { %v1093_v25 = vpop.eup %1092 }
  0xe1   :  { %v212_v26 = vadd.f32 1.0, %v1093_v25 }
  0xe3   :  { %218 = vrot.lane.b32.xlu0 %v216_v23, %s1158_s6  ;;  %1094 = vrcp.f32 %v212_v26 }
  0xf0   :  { %v1095_v27 = vpop.eup %1094 }
 0x151   :  { %v224_v28 = vpop.permute.xlu0 %223 }
 0x152   :  { %v226_v29 = vmul.f32 %v1095_v27, %v224_v28 }
 0x154   :  { %228 = vrot.lane.b32.xlu1 %v226_v29, %s1158_s6 }
 0x155   :  { %v219_v30 = vpop.permute.xlu0 %218 }
 0x156   :  { %v221_v31 = vmul.f32 %v1095_v27, %v219_v30 }
 0x1c6   :  { %v229_v32 = vpop.permute.xlu1 %228 }
 0x1c7   :  { %v231_v33 = vadd.f32 %v229_v32, %v221_v31 }
 0x1c9   :  { %1096 = vtanh.f32 %v231_v33 }
 0x1d6   :  { %v1097_v34 = vpop.eup %1096 }
 0x1d7   :  { %234 = vrot.lane.b32.xlu1 %v1097_v34, %s1157_s5 }
 0x1db   :  { %239 = vrot.lane.b32.xlu1 %v231_v33, %s1159_s3 }
 0x249   :  { %v235_v35 = vpop.permute.xlu1 %234 }
 0x24a   :  { %v1250_v36 = vmul.f32 %v1095_v27, %v235_v35 }
 0x24c   :  { %v966_v37 = vpack.c.bf16 %v1250_v36, %v1250_v36 }
 0x24d   :  { %v240_v38 = vpop.permute.xlu1 %239 }
 0x24e   :  { %242 = vst.msk [vmem:[#allocation4] sm:$0xff] %vm24_vm0, %v240_v38  ;;  %247 = vrot.lane.b32.xlu0 %v966_v37, %s1158_s6 }
 0x255   :  { %v311_v39 = vld [vmem:[#allocation4] sm:$0xff] }
 0x256   :  { %313 = vrot.lane.b32.xlu1 %v311_v39, %s1158_s6 }
 0x2c0   :  { %v248_v40 = vpop.permute.xlu0 %247 }
 0x2c1   :  { %251 = vst.msk [vmem:[#allocation3] sm:$0xf] %vm22_vm1, %v248_v40 }
 0x2c8   :  { %v259_v41 = vld [vmem:[#allocation3] sm:$0xf]  ;;  %v314_v57 = vpop.permute.xlu1 %313 }
 0x2c9   :  { %1029 = vmatmul.mubr.msk.bf16.vlgmr.msra.gmra.mxu1 %vm24_vm0, %v259_v41 }
 0x2ca   :  { %1041 = vmatpush3.bf16.msra.mxu1 %v1196_v2  ;;  %1044 = vmatprep.mubr.msk.bf16.mxu1 %vm1155_vm2, %v1154_v0 }
 0x2cb   :  { %1042 = vmatprep.subr.bf16.mxu1 %v1154_v0 }
 0x2ce   :  { %1043 = vmatpush3.bf16.msra.mxu1 %v1206_v5 }
 0x2cf   :  { %1056 = vmatprep.subr.bf16.mxu1 %v1154_v0 }
 0x389   :  { %v297_v45 = vpop.f32.mrf.mxu1 }
 0x38a   :  { %v303_v46 = vadd.f32 %v297_v45, %v112_v44 }
 0x38b   :  { %v1030_v47 = vpop.f32.mrf.mxu1 }
 0x38c   :  { %1098 = vtanh.f32 %v303_v46  ;;  %v939_v51 = vmul.f32 -1.442695, %v303_v46  ;;  %v120_v46 = vadd.f32 %v1265_v42, %v1242_v15 }
 0x38d   :  { %v300_v48 = vpop.f32.mrf.mxu1 }
 0x38e   :  { %1100 = vpow2.f32 %v939_v51 }
 0x38f   :  { %v1031_v49 = vpop.f32.mrf.mxu1 }
 0x399   :  { %v1099_v50 = vpop.eup %1098 }
 0x39a   :  { %318 = vrot.lane.b32.xlu0 %v1099_v50, %s1157_s5 }
 0x39b   :  { %v1101_v52 = vpop.eup %1100 }
 0x39c   :  { %v307_v53 = vadd.f32 1.0, %v1101_v52 }
 0x39e   :  { %1102 = vrcp.f32 %v307_v53 }
 0x3ab   :  { %v1103_v54 = vpop.eup %1102 }
 0x3ac   :  { %v316_v58 = vmul.f32 %v1103_v54, %v314_v57 }
 0x40c   :  { %v319_v55 = vpop.permute.xlu0 %318 }
 0x40d   :  { %v321_v56 = vmul.f32 %v1103_v54, %v319_v55 }
 0x40f   :  { %323 = vrot.lane.b32.xlu0 %v321_v56, %s1158_s6 }
 0x481   :  { %v324_v59 = vpop.permute.xlu0 %323 }
 0x482   :  { %v326_v60 = vadd.f32 %v324_v59, %v316_v58 }
 0x484   :  { %1104 = vtanh.f32 %v326_v60 }
 0x491   :  { %v1105_v61 = vpop.eup %1104 }
 0x492   :  { %329 = vrot.lane.b32.xlu1 %v1105_v61, %s1157_s5 }
 0x496   :  { %334 = vrot.lane.b32.xlu1 %v326_v60, %s1159_s3 }
 0x504   :  { %v330_v7 = vpop.permute.xlu1 %329 }
 0x505   :  { %v1288_v8 = vmul.f32 %v1103_v54, %v330_v7 }
 0x507   :  { %v967_v9 = vpack.c.bf16 %v1288_v8, %v1288_v8 }
 0x508   :  { %v335_v10 = vpop.permute.xlu1 %334 }
 0x509   :  { %337 = vst.msk [vmem:[#allocation4] sm:$0xff] %vm24_vm0, %v335_v10  ;;  %342 = vrot.lane.b32.xlu0 %v967_v9, %s1158_s6  ;;  %v125_v10 = vadd.f32 %v1242_v15, %v1305_v17 }
 0x510   :  { %v406_v11 = vld [vmem:[#allocation4] sm:$0xff] }
 0x511   :  { %408 = vrot.lane.b32.xlu1 %v406_v11, %s1158_s6 }
 0x57b   :  { %v343_v12 = vpop.permute.xlu0 %342 }
 0x57c   :  { %345 = vst.msk [vmem:[#allocation3] sm:$0xf] %vm22_vm1, %v343_v12 }
 0x583   :  { %v354_v13 = vld [vmem:[#allocation3] sm:$0xf]  ;;  %v409_v14 = vpop.permute.xlu1 %408 }
 0x584   :  { %1037 = vmatmul.mubr.msk.bf16.vlgmr.msra.gmra.mxu0 %vm24_vm0, %v354_v13 }
 0x585   :  { %1049 = vmatpush3.bf16.msra.mxu0 %v1196_v2  ;;  %1052 = vmatprep.mubr.msk.bf16.mxu0 %vm1155_vm2, %v1154_v0 }
 0x586   :  { %1050 = vmatprep.subr.bf16.mxu0 %v1154_v0 }
 0x589   :  { %1051 = vmatpush3.bf16.msra.mxu0 %v1206_v5 }
 0x58a   :  { %1064 = vmatprep.subr.bf16.mxu0 %v1154_v0 }
 0x644   :  { %v392_v21 = vpop.f32.mrf.mxu0 }
 0x645   :  { %v398_v22 = vadd.f32 %v392_v21, %v117_v20 }
 0x646   :  { %v1038_v23 = vpop.f32.mrf.mxu0 }
 0x647   :  { %1106 = vtanh.f32 %v398_v22  ;;  %v943_v27 = vmul.f32 -1.442695, %v398_v22 }
 0x648   :  { %v395_v24 = vpop.f32.mrf.mxu0 }
 0x649   :  { %1108 = vpow2.f32 %v943_v27 }
 0x64a   :  { %v1039_v25 = vpop.f32.mrf.mxu0 }
 0x654   :  { %v1107_v26 = vpop.eup %1106 }
 0x655   :  { %413 = vrot.lane.b32.xlu0 %v1107_v26, %s1157_s5 }
 0x656   :  { %v1109_v28 = vpop.eup %1108 }
 0x657   :  { %v402_v29 = vadd.f32 1.0, %v1109_v28 }
 0x659   :  { %1110 = vrcp.f32 %v402_v29 }
 0x666   :  { %v1111_v30 = vpop.eup %1110 }
 0x667   :  { %v411_v33 = vmul.f32 %v1111_v30, %v409_v14 }
 0x6c7   :  { %v414_v31 = vpop.permute.xlu0 %413 }
 0x6c8   :  { %v416_v32 = vmul.f32 %v1111_v30, %v414_v31 }
 0x6ca   :  { %418 = vrot.lane.b32.xlu0 %v416_v32, %s1158_s6 }
 0x73c   :  { %v419_v34 = vpop.permute.xlu0 %418 }
 0x73d   :  { %v421_v35 = vadd.f32 %v419_v34, %v411_v33 }
 0x73f   :  { %1112 = vtanh.f32 %v421_v35 }
 0x74c   :  { %v1113_v37 = vpop.eup %1112 }
 0x74d   :  { %424 = vrot.lane.b32.xlu1 %v1113_v37, %s1157_s5 }
 0x751   :  { %429 = vrot.lane.b32.xlu1 %v421_v35, %s1159_s3 }
 0x7bf   :  { %v425_v38 = vpop.permute.xlu1 %424 }
 0x7c0   :  { %v1317_v39 = vmul.f32 %v1111_v30, %v425_v38 }
 0x7c2   :  { %v968_v40 = vpack.c.bf16 %v1317_v39, %v1317_v39 }
 0x7c3   :  { %v430_v41 = vpop.permute.xlu1 %429 }
 0x7c4   :  { %432 = vst.msk [vmem:[#allocation4] sm:$0xff] %vm24_vm0, %v430_v41  ;;  %437 = vrot.lane.b32.xlu0 %v968_v40, %s1158_s6  ;;  %v128_v41 = vadd.f32 %v1242_v15, %v1309_v19 }
 0x7cb   :  { %v501_v43 = vld [vmem:[#allocation4] sm:$0xff] }
 0x7cc   :  { %503 = vrot.lane.b32.xlu1 %v501_v43, %s1158_s6 }
 0x836   :  { %v438_v44 = vpop.permute.xlu0 %437 }
 0x837   :  { %440 = vst.msk [vmem:[#allocation3] sm:$0xf] %vm22_vm1, %v438_v44 }
 0x83e   :  { %v449_v45 = vld [vmem:[#allocation3] sm:$0xf]  ;;  %v504_v42 = vpop.permute.xlu1 %503 }
 0x83f   :  { %1045 = vmatmul.mubr.msk.bf16.vlgmr.msra.gmra.mxu1 %vm24_vm0, %v449_v45 }
 0x840   :  { %1057 = vmatpush3.bf16.msra.mxu1 %v1196_v2  ;;  %1060 = vmatprep.mubr.msk.bf16.mxu1 %vm1155_vm2, %v1154_v0 }
 0x841   :  { %1058 = vmatprep.subr.bf16.mxu1 %v1154_v0 }
 0x844   :  { %1059 = vmatpush3.bf16.msra.mxu1 %v1206_v5 }
 0x845   :  { %1072 = vmatprep.subr.bf16.mxu1 %v1154_v0 }
 0x8ff   :  { %v487_v47 = vpop.f32.mrf.mxu1 }
 0x900   :  { %v493_v48 = vadd.f32 %v487_v47, %v120_v46 }
 0x901   :  { %v1046_v49 = vpop.f32.mrf.mxu1 }
 0x902   :  { %1114 = vtanh.f32 %v493_v48  ;;  %v947_v53 = vmul.f32 -1.442695, %v493_v48 }
 0x903   :  { %v490_v50 = vpop.f32.mrf.mxu1 }
 0x904   :  { %1116 = vpow2.f32 %v947_v53 }
 0x905   :  { %v1047_v51 = vpop.f32.mrf.mxu1 }
 0x90f   :  { %v1115_v52 = vpop.eup %1114 }
 0x910   :  { %508 = vrot.lane.b32.xlu0 %v1115_v52, %s1157_s5 }
 0x911   :  { %v1117_v54 = vpop.eup %1116 }
 0x912   :  { %v497_v55 = vadd.f32 1.0, %v1117_v54 }
 0x914   :  { %1118 = vrcp.f32 %v497_v55 }
 0x921   :  { %v1119_v56 = vpop.eup %1118 }
 0x922   :  { %v506_v59 = vmul.f32 %v1119_v56, %v504_v42 }
 0x982   :  { %v509_v57 = vpop.permute.xlu0 %508 }
 0x983   :  { %v511_v58 = vmul.f32 %v1119_v56, %v509_v57 }
 0x985   :  { %513 = vrot.lane.b32.xlu0 %v511_v58, %s1158_s6 }
 0x9f7   :  { %v514_v60 = vpop.permute.xlu0 %513 }
 0x9f8   :  { %v516_v61 = vadd.f32 %v514_v60, %v506_v59 }
 0x9fa   :  { %1120 = vtanh.f32 %v516_v61 }
 0xa07   :  { %v1121_v62 = vpop.eup %1120 }
 0xa08   :  { %519 = vrot.lane.b32.xlu1 %v1121_v62, %s1157_s5  ;;  %v133_v62 = vadd.f32 %v1303_v16, %v1242_v15 }
 0xa0c   :  { %524 = vrot.lane.b32.xlu1 %v516_v61, %s1159_s3 }
 0xa7a   :  { %v520_v63 = vpop.permute.xlu1 %519 }
 0xa7b   :  { %v1338_v1 = vmul.f32 %v1119_v56, %v520_v63 }
 0xa7d   :  { %v969_v3 = vpack.c.bf16 %v1338_v1, %v1338_v1 }
 0xa7e   :  { %v525_v4 = vpop.permute.xlu1 %524 }
 0xa7f   :  { %527 = vst.msk [vmem:[#allocation4] sm:$0xff] %vm24_vm0, %v525_v4  ;;  %532 = vrot.lane.b32.xlu0 %v969_v3, %s1158_s6 }
 0xa86   :  { %v596_v6 = vld [vmem:[#allocation4] sm:$0xff] }
 0xa87   :  { %598 = vrot.lane.b32.xlu1 %v596_v6, %s1158_s6 }
 0xaf1   :  { %v533_v7 = vpop.permute.xlu0 %532 }
 0xaf2   :  { %535 = vst.msk [vmem:[#allocation3] sm:$0xf] %vm22_vm1, %v533_v7 }
 0xaf9   :  { %v544_v9 = vld [vmem:[#allocation3] sm:$0xf]  ;;  %v599_v17 = vpop.permute.xlu1 %598 }
 0xafa   :  { %1053 = vmatmul.mubr.msk.bf16.vlgmr.msra.gmra.mxu0 %vm24_vm0, %v544_v9 }
 0xafb   :  { %1065 = vmatpush3.bf16.msra.mxu0 %v1196_v2  ;;  %1068 = vmatprep.mubr.msk.bf16.mxu0 %vm1155_vm2, %v1154_v0 }
 0xafc   :  { %1066 = vmatprep.subr.bf16.mxu0 %v1154_v0 }
 0xaff   :  { %1067 = vmatpush3.bf16.msra.mxu0 %v1206_v5 }
 0xbba   :  { %v582_v11 = vpop.f32.mrf.mxu0 }
 0xbbb   :  { %v588_v12 = vadd.f32 %v582_v11, %v125_v10 }
 0xbbc   :  { %v1054_v13 = vpop.f32.mrf.mxu0 }
 0xbbd   :  { %1122 = vtanh.f32 %v588_v12  ;;  %v951_v23 = vmul.f32 -1.442695, %v588_v12 }
 0xbbe   :  { %v585_v20 = vpop.f32.mrf.mxu0 }
 0xbbf   :  { %1124 = vpow2.f32 %v951_v23 }
 0xbc0   :  { %v1055_v21 = vpop.f32.mrf.mxu0 }
 0xbca   :  { %v1123_v22 = vpop.eup %1122 }
 0xbcb   :  { %603 = vrot.lane.b32.xlu0 %v1123_v22, %s1157_s5 }
 0xbcc   :  { %v1125_v24 = vpop.eup %1124 }
 0xbcd   :  { %v592_v25 = vadd.f32 1.0, %v1125_v24 }
 0xbcf   :  { %1126 = vrcp.f32 %v592_v25 }
 0xbdc   :  { %v1127_v26 = vpop.eup %1126 }
 0xbdd   :  { %v601_v29 = vmul.f32 %v1127_v26, %v599_v17 }
 0xc3d   :  { %v604_v27 = vpop.permute.xlu0 %603 }
 0xc3e   :  { %v606_v28 = vmul.f32 %v1127_v26, %v604_v27 }
 0xc40   :  { %608 = vrot.lane.b32.xlu0 %v606_v28, %s1158_s6 }
 0xcb2   :  { %v609_v30 = vpop.permute.xlu0 %608 }
 0xcb3   :  { %v611_v31 = vadd.f32 %v609_v30, %v601_v29 }
 0xcb5   :  { %1128 = vtanh.f32 %v611_v31 }
 0xcc2   :  { %v1129_v32 = vpop.eup %1128 }
 0xcc3   :  { %614 = vrot.lane.b32.xlu1 %v1129_v32, %s1157_s5  ;;  %v136_v32 = vadd.f32 %v1307_v18, %v1242_v15 }
 0xcc7   :  { %619 = vrot.lane.b32.xlu1 %v611_v31, %s1159_s3 }
 0xd35   :  { %v615_v14 = vpop.permute.xlu1 %614 }
 0xd36   :  { %v1358_v33 = vmul.f32 %v1127_v26, %v615_v14 }
 0xd38   :  { %v970_v34 = vpack.c.bf16 %v1358_v33, %v1358_v33 }
 0xd39   :  { %v620_v35 = vpop.permute.xlu1 %619 }
 0xd3a   :  { %622 = vst.msk [vmem:[#allocation4] sm:$0xff] %vm24_vm0, %v620_v35  ;;  %627 = vrot.lane.b32.xlu0 %v970_v34, %s1158_s6 }
 0xd41   :  { %v691_v37 = vld [vmem:[#allocation4] sm:$0xff] }
 0xd42   :  { %693 = vrot.lane.b32.xlu1 %v691_v37, %s1158_s6 }
 0xdac   :  { %v628_v38 = vpop.permute.xlu0 %627 }
 0xdad   :  { %630 = vst.msk [vmem:[#allocation3] sm:$0xf] %vm22_vm1, %v628_v38 }
 0xdb4   :  { %v639_v40 = vld [vmem:[#allocation3] sm:$0xf]  ;;  %v694_v19 = vpop.permute.xlu1 %693 }
 0xdb5   :  { %1061 = vmatmul.mubr.msk.bf16.vlgmr.msra.gmra.mxu1 %vm24_vm0, %v639_v40 }
 0xdb6   :  { %1073 = vmatpush3.bf16.msra.mxu1 %v1196_v2  ;;  %1076 = vmatprep.mubr.msk.bf16.mxu1 %vm1155_vm2, %v1154_v0 }
 0xdb7   :  { %1074 = vmatprep.subr.bf16.mxu1 %v1154_v0 }
 0xdba   :  { %1075 = vmatpush3.bf16.msra.mxu1 %v1206_v5 }
 0xe75   :  { %v677_v43 = vpop.f32.mrf.mxu1 }
 0xe76   :  { %v683_v44 = vadd.f32 %v677_v43, %v128_v41 }
 0xe77   :  { %v1062_v45 = vpop.f32.mrf.mxu1 }
 0xe78   :  { %1130 = vtanh.f32 %v683_v44  ;;  %v955_v2 = vmul.f32 -1.442695, %v683_v44 }
 0xe79   :  { %v680_v46 = vpop.f32.mrf.mxu1 }
 0xe7a   :  { %1132 = vpow2.f32 %v955_v2 }
 0xe7b   :  { %v1063_v47 = vpop.f32.mrf.mxu1 }
 0xe85   :  { %v1131_v48 = vpop.eup %1130 }
 0xe86   :  { %698 = vrot.lane.b32.xlu0 %v1131_v48, %s1157_s5 }
 0xe87   :  { %v1133_v49 = vpop.eup %1132 }
 0xe88   :  { %v687_v50 = vadd.f32 1.0, %v1133_v49 }
 0xe8a   :  { %1134 = vrcp.f32 %v687_v50 }
 0xe97   :  { %v1135_v0 = vpop.eup %1134 }
 0xe98   :  { %v696_v52 = vmul.f32 %v1135_v0, %v694_v19 }
 0xef8   :  { %v699_v51 = vpop.permute.xlu0 %698 }
 0xef9   :  { %v701_v5 = vmul.f32 %v1135_v0, %v699_v51 }
 0xefb   :  { %703 = vrot.lane.b32.xlu0 %v701_v5, %s1158_s6 }
 0xf6d   :  { %v704_v53 = vpop.permute.xlu0 %703 }
 0xf6e   :  { %v706_v54 = vadd.f32 %v704_v53, %v696_v52 }
 0xf70   :  { %1136 = vtanh.f32 %v706_v54 }
 0xf7d   :  { %v1137_v55 = vpop.eup %1136 }
 0xf7e   :  { %709 = vrot.lane.b32.xlu1 %v1137_v55, %s1157_s5 }
 0xf82   :  { %714 = vrot.lane.b32.xlu1 %v706_v54, %s1159_s3 }
 0xff0   :  { %v710_v56 = vpop.permute.xlu1 %709 }
 0xff1   :  { %v1378_v57 = vmul.f32 %v1135_v0, %v710_v56 }
 0xff3   :  { %v971_v58 = vpack.c.bf16 %v1378_v57, %v1378_v57 }
 0xff4   :  { %v715_v42 = vpop.permute.xlu1 %714 }
 0xff5   :  { %717 = vst.msk [vmem:[#allocation4] sm:$0xff] %vm24_vm0, %v715_v42  ;;  %722 = vrot.lane.b32.xlu0 %v971_v58, %s1158_s6 }
 0xffc   :  { %v786_v59 = vld [vmem:[#allocation4] sm:$0xff] }
 0xffd   :  { %788 = vrot.lane.b32.xlu1 %v786_v59, %s1158_s6 }
0x1067   :  { %v723_v60 = vpop.permute.xlu0 %722 }
0x1068   :  { %725 = vst.msk [vmem:[#allocation3] sm:$0xf] %vm22_vm1, %v723_v60 }
0x106f   :  { %v734_v61 = vld [vmem:[#allocation3] sm:$0xf]  ;;  %v789_v16 = vpop.permute.xlu1 %788 }
0x1070   :  { %1069 = vmatmul.mubr.msk.bf16.vlgmr.msra.gmra.mxu0 %vm24_vm0, %v734_v61 }
0x1130   :  { %v772_v63 = vpop.f32.mrf.mxu0 }
0x1131   :  { %v778_v3 = vadd.f32 %v772_v63, %v133_v62 }
0x1132   :  { %v1070_v4 = vpop.f32.mrf.mxu0 }
0x1133   :  { %1138 = vtanh.f32 %v778_v3  ;;  %v959_v10 = vmul.f32 -1.442695, %v778_v3 }
0x1134   :  { %v775_v6 = vpop.f32.mrf.mxu0 }
0x1135   :  { %1140 = vpow2.f32 %v959_v10 }
0x1136   :  { %v1071_v7 = vpop.f32.mrf.mxu0 }
0x1140   :  { %v1139_v9 = vpop.eup %1138 }
0x1141   :  { %793 = vrot.lane.b32.xlu0 %v1139_v9, %s1157_s5 }
0x1142   :  { %v1141_v11 = vpop.eup %1140 }
0x1143   :  { %v782_v12 = vadd.f32 1.0, %v1141_v11 }
0x1145   :  { %1142 = vrcp.f32 %v782_v12 }
0x1152   :  { %v1143_v13 = vpop.eup %1142 }
0x1153   :  { %v791_v22 = vmul.f32 %v1143_v13, %v789_v16 }
0x11b3   :  { %v794_v20 = vpop.permute.xlu0 %793 }
0x11b4   :  { %v796_v21 = vmul.f32 %v1143_v13, %v794_v20 }
0x11b6   :  { %798 = vrot.lane.b32.xlu0 %v796_v21, %s1158_s6 }
0x1228   :  { %v799_v23 = vpop.permute.xlu0 %798 }
0x1229   :  { %v801_v24 = vadd.f32 %v799_v23, %v791_v22 }
0x122b   :  { %1144 = vtanh.f32 %v801_v24 }
0x1238   :  { %v1145_v25 = vpop.eup %1144 }
0x1239   :  { %804 = vrot.lane.b32.xlu1 %v1145_v25, %s1157_s5 }
0x123d   :  { %809 = vrot.lane.b32.xlu1 %v801_v24, %s1159_s3 }
0x12ab   :  { %v805_v26 = vpop.permute.xlu1 %804 }
0x12ac   :  { %v807_v27 = vmul.f32 %v1143_v13, %v805_v26 }
0x12ae   :  { %v972_v28 = vpack.c.bf16 %v807_v27, %v807_v27 }
0x12af   :  { %v810_v17 = vpop.permute.xlu1 %809 }
0x12b0   :  { %812 = vst.msk [vmem:[#allocation4] sm:$0xff] %vm24_vm0, %v810_v17  ;;  %817 = vrot.lane.b32.xlu0 %v972_v28, %s1158_s6 }
0x12b7   :  { %v881_v29 = vld [vmem:[#allocation4] sm:$0xff] }
0x12b8   :  { %883 = vrot.lane.b32.xlu1 %v881_v29, %s1158_s6 }
0x1322   :  { %v818_v30 = vpop.permute.xlu0 %817 }
0x1323   :  { %820 = vst.msk [vmem:[#allocation3] sm:$0xf] %vm22_vm1, %v818_v30 }
0x132a   :  { %v829_v31 = vld [vmem:[#allocation3] sm:$0xf]  ;;  %v884_v15 = vpop.permute.xlu1 %883 }
0x132b   :  { %1077 = vmatmul.mubr.msk.bf16.vlgmr.msra.gmra.mxu1 %vm24_vm0, %v829_v31 }
0x13eb   :  { %v867_v14 = vpop.f32.mrf.mxu1 }
0x13ec   :  { %v873_v34 = vadd.f32 %v867_v14, %v136_v32 }
0x13ed   :  { %v1078_v35 = vpop.f32.mrf.mxu1 }
0x13ee   :  { %1146 = vtanh.f32 %v873_v34  ;;  %v963_v41 = vmul.f32 -1.442695, %v873_v34 }
0x13ef   :  { %v870_v37 = vpop.f32.mrf.mxu1 }
0x13f0   :  { %1148 = vpow2.f32 %v963_v41 }
0x13f1   :  { %v1079_v38 = vpop.f32.mrf.mxu1 }
0x13fb   :  { %v1147_v40 = vpop.eup %1146 }
0x13fc   :  { %888 = vrot.lane.b32.xlu0 %v1147_v40, %s1157_s5 }
0x13fd   :  { %v1149_v43 = vpop.eup %1148 }
0x13fe   :  { %v877_v44 = vadd.f32 1.0, %v1149_v43 }
0x1400   :  { %1150 = vrcp.f32 %v877_v44 }
0x140d   :  { %v1151_v45 = vpop.eup %1150 }
0x140e   :  { %v886_v18 = vmul.f32 %v1151_v45, %v884_v15 }
0x146e   :  { %v889_v46 = vpop.permute.xlu0 %888 }
0x146f   :  { %v891_v47 = vmul.f32 %v1151_v45, %v889_v46 }
0x1471   :  { %893 = vrot.lane.b32.xlu0 %v891_v47, %s1158_s6 }
0x1475   :  { %253 = vrot.lane.b32.xlu0 %v1250_v36, %s1158_s6 }
0x1479   :  { %442 = vrot.lane.b32.xlu0 %v1317_v39, %s1158_s6 }
0x147d   :  { %632 = vrot.lane.b32.xlu0 %v1358_v33, %s1158_s6 }
0x1481   :  { %822 = vrot.lane.b32.xlu0 %v807_v27, %s1158_s6 }
0x14e3   :  { %v894_v48 = vpop.permute.xlu0 %893 }
0x14e4   :  { %v896_v2 = vadd.f32 %v894_v48, %v886_v18 }
0x14e6   :  { %1152 = vtanh.f32 %v896_v2 }
0x14e7   :  { %v254_v49 = vpop.permute.xlu0 %253 }
0x14e8   :  { %256 = vst.msk [vmem:[%s1457_s4] sm:$0xff] %vm24_vm0, %v254_v49 }
0x14eb   :  { %v443_v36 = vpop.permute.xlu0 %442 }
0x14ec   :  { %945 = vst.msk [vmem:[%s1457_s4 + $0x10] sm:$0xff] %vm24_vm0, %v443_v36 }
0x14ef   :  { %v633_v39 = vpop.permute.xlu0 %632 }
0x14f0   :  { %953 = vst.msk [vmem:[%s1457_s4 + $0x20] sm:$0xff] %vm24_vm0, %v633_v39 }
0x14f3   :  { %v1153_v33 = vpop.eup %1152  ;;  %v823_v50 = vpop.permute.xlu0 %822 }
0x14f4   :  { %961 = vst.msk [vmem:[%s1457_s4 + $0x30] sm:$0xff] %vm24_vm0, %v823_v50  ;;  %899 = vrot.lane.b32.xlu1 %v1153_v33, %s1157_s5 }
0x14f8   :  { %347 = vrot.lane.b32.xlu1 %v1288_v8, %s1158_s6 }
0x14fc   :  { %537 = vrot.lane.b32.xlu1 %v1338_v1, %s1158_s6 }
0x1500   :  { %727 = vrot.lane.b32.xlu1 %v1378_v57, %s1158_s6 }
0x1504   :  { %904 = vrot.lane.b32.xlu1 %v896_v2, %s1159_s3 }
0x1566   :  { %v900_v0 = vpop.permute.xlu1 %899 }
0x1567   :  { %v902_v51 = vmul.f32 %v1151_v45, %v900_v0 }
0x1569   :  { %v973_v5 = vpack.c.bf16 %v902_v51, %v902_v51  ;;  %917 = vrot.lane.b32.xlu1 %v902_v51, %s1158_s6 }
0x156a   :  { %v348_v19 = vpop.permute.xlu1 %347 }
0x156b   :  { %941 = vst.msk [vmem:[%s1457_s4 + $0x8] sm:$0xff] %vm24_vm0, %v348_v19  ;;  %912 = vrot.lane.b32.xlu0 %v973_v5, %s1158_s6 }
0x156e   :  { %v538_v8 = vpop.permute.xlu1 %537 }
0x156f   :  { %949 = vst.msk [vmem:[%s1457_s4 + $0x18] sm:$0xff] %vm24_vm0, %v538_v8 }
0x1572   :  { %v728_v1 = vpop.permute.xlu1 %727 }
0x1573   :  { %957 = vst.msk [vmem:[%s1457_s4 + $0x28] sm:$0xff] %vm24_vm0, %v728_v1 }
0x1576   :  { %v905_v52 = vpop.permute.xlu1 %904 }
0x1577   :  { %907 = vst.msk [vmem:[#allocation4] sm:$0xff] %vm24_vm0, %v905_v52 }
0x15db   :  { %v918_v53 = vpop.permute.xlu1 %917 }
0x15dc   :  { %965 = vst.msk [vmem:[%s1457_s4 + $0x38] sm:$0xff] %vm24_vm0, %v918_v53 }
0x15dd   :  { %v913_v54 = vpop.permute.xlu0 %912 }
0x15de   :  { %915 = vst.msk [vmem:[#allocation3] sm:$0xf] %vm22_vm1, %v913_v54 }

// kernel: lstm_model_forward.3
= control target key start
LH: loop header
LB: loop body
LE: loop exit
PB: predicated region body
PF: predicated region fallthrough
CT: control target
= control target key end

     0   :  { %vm22_vm0 = vcmask 257024   ;;  %v1142_v0 = vmov 0.0   ;;  %vm1143_vm1 = vmmov 0   ;;  %v1144_v3 = vmov 0   ;;  %s1145_s29 = smov 64   ;;  %s1146_s30 = smov 32   ;;  %s1438_s1 = inlined_call_operand.vmem [shape: bf16[16,128], index: 1, kind: input, shape index: {}]   ;;  %s1439_s2 = inlined_call_operand.vmem [shape: bf16[32,128], index: 2, kind: input, shape index: {}]   ;;  %s1440_s0 = inlined_call_operand.vmem [shape: f32[8,8,16], index: 0, kind: input, shape index: {}]   ;;  %s1441_s3 = inlined_call_operand.vmem [shape: f32[1,128], index: 3, kind: input, shape index: {}]   ;;  %s1442_s4 = inlined_call_operand.vmem [shape: f32[8,8,32], index: 4, kind: output, shape index: {}]  }
   0x1   :  { %1005 = vmatprep.subr.bf16.mxu1 %v1142_v0  ;;  %v1075_v1 = vld [vmem:[%s1438_s1] sm:$0xff]   ;;  %1009 = vmatprep.mubr.msk.bf16.mxu1 %vm1143_vm1, %v1142_v0  ;;  %v1182_v2 = vld [vmem:[%s1439_s2 + $0x8] sm:$0xff]   ;;  %23 = vst.msk [vmem:[#allocation3] sm:$0xf] %vm22_vm0, %v1144_v3  ;;  %vm24_vm2 = vcmask 261120   ;;  %vm53_vm3 = vcmask 130048  }
   0x2   :  { %995 = vmatprep.subr.bf16.mxu0 %v1075_v1  ;;  %v26_v4 = vld [vmem:[%s1440_s0] sm:$0xff]  ;;  %v27_v5 = vld [vmem:[%s1440_s0 + $0x8] sm:$0xff]  ;;  %v28_v6 = vld [vmem:[%s1440_s0 + $0x10] sm:$0xff]  ;;  %25 = vst.msk [vmem:[#allocation4] sm:$0xff] %vm24_vm2, %v1142_v0  ;;  %1006 = vmatpush3.bf16.msra.mxu1 %v1182_v2 }
   0x3   :  { %996 = vmatpush3.bf16.msra.mxu0 %v1075_v1  ;;  %v34_v7 = vpack.c.bf16 %v27_v5, %v26_v4  ;;  %v29_v8 = vld [vmem:[%s1440_s0 + $0x18] sm:$0xff]  ;;  %1007 = vmatprep.subr.bf16.mxu1 %v1142_v0  ;;  %v1204_v10 = vld [vmem:[%s1439_s2] sm:$0xff]   ;;  %v31_v62 = vld [vmem:[%s1440_s0 + $0x28] sm:$0xff] }
   0x4   :  { %v35_v9 = vpack.c.bf16 %v29_v8, %v28_v6  ;;  %1021 = vmatprep.subr.bf16.mxu0 %v1142_v0  ;;  %v1227_v13 = vld [vmem:[%s1441_s3] ss:$0 sm:$0xff]  ;;  %s1147_s3 = smov 96   ;;  %v32_v63 = vld [vmem:[%s1440_s0 + $0x30] sm:$0xff]  ;;  %v33_v3 = vld [vmem:[%s1440_s0 + $0x38] sm:$0xff] }
   0x5   :  { %997 = vmatprep.mubr.msk.bf16.mxu0 %vm53_vm3, %v34_v7  ;;  %v30_v61 = vld [vmem:[%s1440_s0 + $0x20] sm:$0xff]  ;;  %v37_v4 = vpack.c.bf16 %v33_v3, %v32_v63 }
   0x6   :  { %998 = vmatmul.mubr.msk.bf16.vlgmr.msra.gmra.mxu0 %vm53_vm3, %v35_v9  ;;  %1008 = vmatpush3.bf16.msra.mxu1 %v1204_v10  ;;  %v36_v1 = vpack.c.bf16 %v31_v62, %v30_v61 }
   0x7   :  { %1022 = vmatpush3.bf16.msra.mxu0 %v1182_v2  ;;  %1013 = vmatprep.subr.bf16.mxu1 %v1142_v0 }
   0x8   :  { %v144_v11 = vld [vmem:[#allocation3] sm:$0xf]  ;;  %1023 = vmatprep.subr.bf16.mxu0 %v1142_v0  ;;  %1001 = vmatprep.mubr.msk.bf16.mxu0 %vm53_vm3, %v36_v1 }
   0x9   :  { %1010 = vmatmul.mubr.msk.bf16.vlgmr.msra.gmra.mxu1 %vm24_vm2, %v144_v11  ;;  %v209_v22 = vld [vmem:[#allocation4] sm:$0xff] }
   0xa   :  { %1014 = vmatpush3.bf16.msra.mxu1 %v1182_v2  ;;  %1017 = vmatprep.mubr.msk.bf16.mxu1 %vm1143_vm1, %v1142_v0 }
   0xb   :  { %1015 = vmatprep.subr.bf16.mxu1 %v1142_v0  ;;  %1024 = vmatpush3.bf16.msra.mxu0 %v1204_v10 }
   0xc   :  { %1037 = vmatprep.subr.bf16.mxu0 %v1142_v0 }
   0xe   :  { %1016 = vmatpush3.bf16.msra.mxu1 %v1204_v10  ;;  %1002 = vmatmul.mubr.msk.bf16.gmra.mxu0 %vm53_vm3, %v37_v4 }
   0xf   :  { %1029 = vmatprep.subr.bf16.mxu1 %v1142_v0  ;;  %1025 = vmatprep.mubr.msk.bf16.mxu0 %vm1143_vm1, %v1142_v0 }
  0xc6   :  { %v1222_v12 = vpop.f32.mrf.mxu0 }
  0xc8   :  { %v100_v14 = vpop.f32.mrf.mxu0 }
  0xc9   :  { %v101_v15 = vadd.f32 %v1227_v13, %v100_v14  ;;  %v195_v16 = vpop.f32.mrf.mxu1 }
  0xca   :  { %v1250_v41 = vpop.f32.mrf.mxu0 }
  0xcb   :  { %v201_v17 = vadd.f32 %v195_v16, %v101_v15  ;;  %v1011_v18 = vpop.f32.mrf.mxu1 }
  0xcc   :  { %v103_v42 = vpop.f32.mrf.mxu0 }
  0xcd   :  { %1078 = vtanh.f32 %v201_v17  ;;  %v198_v19 = vpop.f32.mrf.mxu1  ;;  %v928_v23 = vmul.f32 -1.442695, %v201_v17  ;;  %v104_v43 = vadd.f32 %v1227_v13, %v103_v42 }
  0xce   :  { %v1288_v15 = vpop.f32.mrf.mxu0  ;;  %v109_v19 = vadd.f32 %v1222_v12, %v1227_v13 }
  0xcf   :  { %v1012_v20 = vpop.f32.mrf.mxu1  ;;  %1080 = vpow2.f32 %v928_v23 }
  0xd0   :  { %v1290_v16 = vpop.f32.mrf.mxu0 }
  0xd2   :  { %v1292_v17 = vpop.f32.mrf.mxu0 }
  0xd4   :  { %v1294_v18 = vpop.f32.mrf.mxu0 }
  0xda   :  { %v1079_v21 = vpop.eup %1078 }
  0xdb   :  { %216 = vrot.lane.b32.xlu0 %v1079_v21, %s1145_s29 }
  0xdc   :  { %v1081_v24 = vpop.eup %1080 }
  0xdd   :  { %v205_v25 = vadd.f32 1.0, %v1081_v24 }
  0xdf   :  { %211 = vrot.lane.b32.xlu0 %v209_v22, %s1146_s30  ;;  %1082 = vrcp.f32 %v205_v25 }
  0xec   :  { %v1083_v26 = vpop.eup %1082 }
 0x14d   :  { %v217_v27 = vpop.permute.xlu0 %216 }
 0x14e   :  { %v219_v28 = vmul.f32 %v1083_v26, %v217_v27 }
 0x150   :  { %221 = vrot.lane.b32.xlu1 %v219_v28, %s1146_s30 }
 0x151   :  { %v212_v29 = vpop.permute.xlu0 %211 }
 0x152   :  { %v214_v30 = vmul.f32 %v1083_v26, %v212_v29 }
 0x1c2   :  { %v222_v31 = vpop.permute.xlu1 %221 }
 0x1c3   :  { %v224_v32 = vadd.f32 %v222_v31, %v214_v30 }
 0x1c5   :  { %1084 = vtanh.f32 %v224_v32 }
 0x1d2   :  { %v1085_v33 = vpop.eup %1084 }
 0x1d3   :  { %227 = vrot.lane.b32.xlu1 %v1085_v33, %s1145_s29 }
 0x1d7   :  { %232 = vrot.lane.b32.xlu1 %v224_v32, %s1147_s3 }
 0x245   :  { %v228_v34 = vpop.permute.xlu1 %227 }
 0x246   :  { %v1235_v35 = vmul.f32 %v1083_v26, %v228_v34 }
 0x248   :  { %v958_v36 = vpack.c.bf16 %v1235_v35, %v1235_v35 }
 0x249   :  { %v233_v37 = vpop.permute.xlu1 %232 }
 0x24a   :  { %235 = vst.msk [vmem:[#allocation4] sm:$0xff] %vm24_vm2, %v233_v37  ;;  %240 = vrot.lane.b32.xlu0 %v958_v36, %s1146_s30 }
 0x251   :  { %v304_v38 = vld [vmem:[#allocation4] sm:$0xff] }
 0x252   :  { %306 = vrot.lane.b32.xlu1 %v304_v38, %s1146_s30 }
 0x2bc   :  { %v241_v39 = vpop.permute.xlu0 %240 }
 0x2bd   :  { %244 = vst.msk [vmem:[#allocation3] sm:$0xf] %vm22_vm0, %v241_v39 }
 0x2c4   :  { %v252_v40 = vld [vmem:[#allocation3] sm:$0xf]  ;;  %v307_v56 = vpop.permute.xlu1 %306 }
 0x2c5   :  { %1018 = vmatmul.mubr.msk.bf16.vlgmr.msra.gmra.mxu1 %vm24_vm2, %v252_v40 }
 0x2c6   :  { %1030 = vmatpush3.bf16.msra.mxu1 %v1182_v2  ;;  %1033 = vmatprep.mubr.msk.bf16.mxu1 %vm1143_vm1, %v1142_v0 }
 0x2c7   :  { %1031 = vmatprep.subr.bf16.mxu1 %v1142_v0 }
 0x2ca   :  { %1032 = vmatpush3.bf16.msra.mxu1 %v1204_v10 }
 0x2cb   :  { %1045 = vmatprep.subr.bf16.mxu1 %v1142_v0 }
 0x385   :  { %v290_v44 = vpop.f32.mrf.mxu1 }
 0x386   :  { %v296_v45 = vadd.f32 %v290_v44, %v104_v43 }
 0x387   :  { %v1019_v46 = vpop.f32.mrf.mxu1 }
 0x388   :  { %1086 = vtanh.f32 %v296_v45  ;;  %v931_v50 = vmul.f32 -1.442695, %v296_v45  ;;  %v112_v45 = vadd.f32 %v1250_v41, %v1227_v13 }
 0x389   :  { %v293_v47 = vpop.f32.mrf.mxu1 }
 0x38a   :  { %1088 = vpow2.f32 %v931_v50 }
 0x38b   :  { %v1020_v48 = vpop.f32.mrf.mxu1 }
 0x395   :  { %v1087_v49 = vpop.eup %1086 }
 0x396   :  { %311 = vrot.lane.b32.xlu0 %v1087_v49, %s1145_s29 }
 0x397   :  { %v1089_v51 = vpop.eup %1088 }
 0x398   :  { %v300_v52 = vadd.f32 1.0, %v1089_v51 }
 0x39a   :  { %1090 = vrcp.f32 %v300_v52 }
 0x3a7   :  { %v1091_v53 = vpop.eup %1090 }
 0x3a8   :  { %v309_v57 = vmul.f32 %v1091_v53, %v307_v56 }
 0x408   :  { %v312_v54 = vpop.permute.xlu0 %311 }
 0x409   :  { %v314_v55 = vmul.f32 %v1091_v53, %v312_v54 }
 0x40b   :  { %316 = vrot.lane.b32.xlu0 %v314_v55, %s1146_s30 }
 0x47d   :  { %v317_v58 = vpop.permute.xlu0 %316 }
 0x47e   :  { %v319_v59 = vadd.f32 %v317_v58, %v309_v57 }
 0x480   :  { %1092 = vtanh.f32 %v319_v59 }
 0x48d   :  { %v1093_v60 = vpop.eup %1092 }
 0x48e   :  { %322 = vrot.lane.b32.xlu1 %v1093_v60, %s1145_s29 }
 0x492   :  { %327 = vrot.lane.b32.xlu1 %v319_v59, %s1147_s3 }
 0x500   :  { %v323_v5 = vpop.permute.xlu1 %322 }
 0x501   :  { %v1273_v6 = vmul.f32 %v1091_v53, %v323_v5 }
 0x503   :  { %v959_v7 = vpack.c.bf16 %v1273_v6, %v1273_v6 }
 0x504   :  { %v328_v8 = vpop.permute.xlu1 %327 }
 0x505   :  { %330 = vst.msk [vmem:[#allocation4] sm:$0xff] %vm24_vm2, %v328_v8  ;;  %335 = vrot.lane.b32.xlu0 %v959_v7, %s1146_s30  ;;  %v117_v8 = vadd.f32 %v1227_v13, %v1290_v16 }
 0x50c   :  { %v399_v9 = vld [vmem:[#allocation4] sm:$0xff] }
 0x50d   :  { %401 = vrot.lane.b32.xlu1 %v399_v9, %s1146_s30 }
 0x577   :  { %v336_v11 = vpop.permute.xlu0 %335 }
 0x578   :  { %338 = vst.msk [vmem:[#allocation3] sm:$0xf] %vm22_vm0, %v336_v11 }
 0x57f   :  { %v347_v14 = vld [vmem:[#allocation3] sm:$0xf]  ;;  %v402_v12 = vpop.permute.xlu1 %401 }
 0x580   :  { %1026 = vmatmul.mubr.msk.bf16.vlgmr.msra.gmra.mxu0 %vm24_vm2, %v347_v14 }
 0x581   :  { %1038 = vmatpush3.bf16.msra.mxu0 %v1182_v2  ;;  %1041 = vmatprep.mubr.msk.bf16.mxu0 %vm1143_vm1, %v1142_v0 }
 0x582   :  { %1039 = vmatprep.subr.bf16.mxu0 %v1142_v0 }
 0x585   :  { %1040 = vmatpush3.bf16.msra.mxu0 %v1204_v10 }
 0x586   :  { %1053 = vmatprep.subr.bf16.mxu0 %v1142_v0 }
 0x640   :  { %v385_v20 = vpop.f32.mrf.mxu0 }
 0x641   :  { %v391_v21 = vadd.f32 %v385_v20, %v109_v19 }
 0x642   :  { %v1027_v22 = vpop.f32.mrf.mxu0 }
 0x643   :  { %1094 = vtanh.f32 %v391_v21  ;;  %v935_v26 = vmul.f32 -1.442695, %v391_v21 }
 0x644   :  { %v388_v23 = vpop.f32.mrf.mxu0 }
 0x645   :  { %1096 = vpow2.f32 %v935_v26 }
 0x646   :  { %v1028_v24 = vpop.f32.mrf.mxu0 }
 0x650   :  { %v1095_v25 = vpop.eup %1094 }
 0x651   :  { %406 = vrot.lane.b32.xlu0 %v1095_v25, %s1145_s29 }
 0x652   :  { %v1097_v27 = vpop.eup %1096 }
 0x653   :  { %v395_v28 = vadd.f32 1.0, %v1097_v27 }
 0x655   :  { %1098 = vrcp.f32 %v395_v28 }
 0x662   :  { %v1099_v29 = vpop.eup %1098 }
 0x663   :  { %v404_v32 = vmul.f32 %v1099_v29, %v402_v12 }
 0x6c3   :  { %v407_v30 = vpop.permute.xlu0 %406 }
 0x6c4   :  { %v409_v31 = vmul.f32 %v1099_v29, %v407_v30 }
 0x6c6   :  { %411 = vrot.lane.b32.xlu0 %v409_v31, %s1146_s30 }
 0x738   :  { %v412_v33 = vpop.permute.xlu0 %411 }
 0x739   :  { %v414_v34 = vadd.f32 %v412_v33, %v404_v32 }
 0x73b   :  { %1100 = vtanh.f32 %v414_v34 }
 0x748   :  { %v1101_v36 = vpop.eup %1100 }
 0x749   :  { %417 = vrot.lane.b32.xlu1 %v1101_v36, %s1145_s29 }
 0x74d   :  { %422 = vrot.lane.b32.xlu1 %v414_v34, %s1147_s3 }
 0x7bb   :  { %v418_v37 = vpop.permute.xlu1 %417 }
 0x7bc   :  { %v1302_v38 = vmul.f32 %v1099_v29, %v418_v37 }
 0x7be   :  { %v960_v39 = vpack.c.bf16 %v1302_v38, %v1302_v38 }
 0x7bf   :  { %v423_v40 = vpop.permute.xlu1 %422 }
 0x7c0   :  { %425 = vst.msk [vmem:[#allocation4] sm:$0xff] %vm24_vm2, %v423_v40  ;;  %430 = vrot.lane.b32.xlu0 %v960_v39, %s1146_s30  ;;  %v120_v40 = vadd.f32 %v1227_v13, %v1294_v18 }
 0x7c7   :  { %v494_v42 = vld [vmem:[#allocation4] sm:$0xff] }
 0x7c8   :  { %496 = vrot.lane.b32.xlu1 %v494_v42, %s1146_s30 }
 0x832   :  { %v431_v43 = vpop.permute.xlu0 %430 }
 0x833   :  { %433 = vst.msk [vmem:[#allocation3] sm:$0xf] %vm22_vm0, %v431_v43 }
 0x83a   :  { %v442_v44 = vld [vmem:[#allocation3] sm:$0xf]  ;;  %v497_v41 = vpop.permute.xlu1 %496 }
 0x83b   :  { %1034 = vmatmul.mubr.msk.bf16.vlgmr.msra.gmra.mxu1 %vm24_vm2, %v442_v44 }
 0x83c   :  { %1046 = vmatpush3.bf16.msra.mxu1 %v1182_v2  ;;  %1049 = vmatprep.mubr.msk.bf16.mxu1 %vm1143_vm1, %v1142_v0 }
 0x83d   :  { %1047 = vmatprep.subr.bf16.mxu1 %v1142_v0 }
 0x840   :  { %1048 = vmatpush3.bf16.msra.mxu1 %v1204_v10 }
 0x841   :  { %1061 = vmatprep.subr.bf16.mxu1 %v1142_v0 }
 0x8fb   :  { %v480_v46 = vpop.f32.mrf.mxu1 }
 0x8fc   :  { %v486_v47 = vadd.f32 %v480_v46, %v112_v45 }
 0x8fd   :  { %v1035_v48 = vpop.f32.mrf.mxu1 }
 0x8fe   :  { %1102 = vtanh.f32 %v486_v47  ;;  %v939_v52 = vmul.f32 -1.442695, %v486_v47 }
 0x8ff   :  { %v483_v49 = vpop.f32.mrf.mxu1 }
 0x900   :  { %1104 = vpow2.f32 %v939_v52 }
 0x901   :  { %v1036_v50 = vpop.f32.mrf.mxu1 }
 0x90b   :  { %v1103_v51 = vpop.eup %1102 }
 0x90c   :  { %501 = vrot.lane.b32.xlu0 %v1103_v51, %s1145_s29 }
 0x90d   :  { %v1105_v53 = vpop.eup %1104 }
 0x90e   :  { %v490_v54 = vadd.f32 1.0, %v1105_v53 }
 0x910   :  { %1106 = vrcp.f32 %v490_v54 }
 0x91d   :  { %v1107_v55 = vpop.eup %1106 }
 0x91e   :  { %v499_v58 = vmul.f32 %v1107_v55, %v497_v41 }
 0x97e   :  { %v502_v56 = vpop.permute.xlu0 %501 }
 0x97f   :  { %v504_v57 = vmul.f32 %v1107_v55, %v502_v56 }
 0x981   :  { %506 = vrot.lane.b32.xlu0 %v504_v57, %s1146_s30 }
 0x9f3   :  { %v507_v59 = vpop.permute.xlu0 %506 }
 0x9f4   :  { %v509_v60 = vadd.f32 %v507_v59, %v499_v58 }
 0x9f6   :  { %1108 = vtanh.f32 %v509_v60 }
 0xa03   :  { %v1109_v61 = vpop.eup %1108 }
 0xa04   :  { %512 = vrot.lane.b32.xlu1 %v1109_v61, %s1145_s29  ;;  %v125_v61 = vadd.f32 %v1288_v15, %v1227_v13 }
 0xa08   :  { %517 = vrot.lane.b32.xlu1 %v509_v60, %s1147_s3 }
 0xa76   :  { %v513_v62 = vpop.permute.xlu1 %512 }
 0xa77   :  { %v1323_v63 = vmul.f32 %v1107_v55, %v513_v62 }
 0xa79   :  { %v961_v1 = vpack.c.bf16 %v1323_v63, %v1323_v63 }
 0xa7a   :  { %v518_v3 = vpop.permute.xlu1 %517 }
 0xa7b   :  { %520 = vst.msk [vmem:[#allocation4] sm:$0xff] %vm24_vm2, %v518_v3  ;;  %525 = vrot.lane.b32.xlu0 %v961_v1, %s1146_s30 }
 0xa82   :  { %v589_v4 = vld [vmem:[#allocation4] sm:$0xff] }
 0xa83   :  { %591 = vrot.lane.b32.xlu1 %v589_v4, %s1146_s30 }
 0xaed   :  { %v526_v5 = vpop.permute.xlu0 %525 }
 0xaee   :  { %528 = vst.msk [vmem:[#allocation3] sm:$0xf] %vm22_vm0, %v526_v5 }
 0xaf5   :  { %v537_v7 = vld [vmem:[#allocation3] sm:$0xf]  ;;  %v592_v16 = vpop.permute.xlu1 %591 }
 0xaf6   :  { %1042 = vmatmul.mubr.msk.bf16.vlgmr.msra.gmra.mxu0 %vm24_vm2, %v537_v7 }
 0xaf7   :  { %1054 = vmatpush3.bf16.msra.mxu0 %v1182_v2  ;;  %1057 = vmatprep.mubr.msk.bf16.mxu0 %vm1143_vm1, %v1142_v0 }
 0xaf8   :  { %1055 = vmatprep.subr.bf16.mxu0 %v1142_v0 }
 0xafb   :  { %1056 = vmatpush3.bf16.msra.mxu0 %v1204_v10 }
 0xbb6   :  { %v575_v9 = vpop.f32.mrf.mxu0 }
 0xbb7   :  { %v581_v11 = vadd.f32 %v575_v9, %v117_v8 }
 0xbb8   :  { %v1043_v14 = vpop.f32.mrf.mxu0 }
 0xbb9   :  { %1110 = vtanh.f32 %v581_v11  ;;  %v943_v22 = vmul.f32 -1.442695, %v581_v11 }
 0xbba   :  { %v578_v19 = vpop.f32.mrf.mxu0 }
 0xbbb   :  { %1112 = vpow2.f32 %v943_v22 }
 0xbbc   :  { %v1044_v20 = vpop.f32.mrf.mxu0 }
 0xbc6   :  { %v1111_v21 = vpop.eup %1110 }
 0xbc7   :  { %596 = vrot.lane.b32.xlu0 %v1111_v21, %s1145_s29 }
 0xbc8   :  { %v1113_v23 = vpop.eup %1112 }
 0xbc9   :  { %v585_v24 = vadd.f32 1.0, %v1113_v23 }
 0xbcb   :  { %1114 = vrcp.f32 %v585_v24 }
 0xbd8   :  { %v1115_v25 = vpop.eup %1114 }
 0xbd9   :  { %v594_v28 = vmul.f32 %v1115_v25, %v592_v16 }
 0xc39   :  { %v597_v26 = vpop.permute.xlu0 %596 }
 0xc3a   :  { %v599_v27 = vmul.f32 %v1115_v25, %v597_v26 }
 0xc3c   :  { %601 = vrot.lane.b32.xlu0 %v599_v27, %s1146_s30 }
 0xcae   :  { %v602_v29 = vpop.permute.xlu0 %601 }
 0xcaf   :  { %v604_v30 = vadd.f32 %v602_v29, %v594_v28 }
 0xcb1   :  { %1116 = vtanh.f32 %v604_v30 }
 0xcbe   :  { %v1117_v31 = vpop.eup %1116 }
 0xcbf   :  { %607 = vrot.lane.b32.xlu1 %v1117_v31, %s1145_s29  ;;  %v128_v31 = vadd.f32 %v1292_v17, %v1227_v13 }
 0xcc3   :  { %612 = vrot.lane.b32.xlu1 %v604_v30, %s1147_s3 }
 0xd31   :  { %v608_v12 = vpop.permute.xlu1 %607 }
 0xd32   :  { %v1343_v32 = vmul.f32 %v1115_v25, %v608_v12 }
 0xd34   :  { %v962_v33 = vpack.c.bf16 %v1343_v32, %v1343_v32 }
 0xd35   :  { %v613_v34 = vpop.permute.xlu1 %612 }
 0xd36   :  { %615 = vst.msk [vmem:[#allocation4] sm:$0xff] %vm24_vm2, %v613_v34  ;;  %620 = vrot.lane.b32.xlu0 %v962_v33, %s1146_s30 }
 0xd3d   :  { %v684_v36 = vld [vmem:[#allocation4] sm:$0xff] }
 0xd3e   :  { %686 = vrot.lane.b32.xlu1 %v684_v36, %s1146_s30 }
 0xda8   :  { %v621_v37 = vpop.permute.xlu0 %620 }
 0xda9   :  { %623 = vst.msk [vmem:[#allocation3] sm:$0xf] %vm22_vm0, %v621_v37 }
 0xdb0   :  { %v632_v39 = vld [vmem:[#allocation3] sm:$0xf]  ;;  %v687_v18 = vpop.permute.xlu1 %686 }
 0xdb1   :  { %1050 = vmatmul.mubr.msk.bf16.vlgmr.msra.gmra.mxu1 %vm24_vm2, %v632_v39 }
 0xdb2   :  { %1062 = vmatpush3.bf16.msra.mxu1 %v1182_v2  ;;  %1065 = vmatprep.mubr.msk.bf16.mxu1 %vm1143_vm1, %v1142_v0 }
 0xdb3   :  { %1063 = vmatprep.subr.bf16.mxu1 %v1142_v0 }
 0xdb6   :  { %1064 = vmatpush3.bf16.msra.mxu1 %v1204_v10 }
 0xe71   :  { %v670_v42 = vpop.f32.mrf.mxu1 }
 0xe72   :  { %v676_v43 = vadd.f32 %v670_v42, %v120_v40 }
 0xe73   :  { %v1051_v44 = vpop.f32.mrf.mxu1 }
 0xe74   :  { %1118 = vtanh.f32 %v676_v43  ;;  %v947_v2 = vmul.f32 -1.442695, %v676_v43 }
 0xe75   :  { %v673_v45 = vpop.f32.mrf.mxu1 }
 0xe76   :  { %1120 = vpow2.f32 %v947_v2 }
 0xe77   :  { %v1052_v46 = vpop.f32.mrf.mxu1 }
 0xe81   :  { %v1119_v47 = vpop.eup %1118 }
 0xe82   :  { %691 = vrot.lane.b32.xlu0 %v1119_v47, %s1145_s29 }
 0xe83   :  { %v1121_v48 = vpop.eup %1120 }
 0xe84   :  { %v680_v49 = vadd.f32 1.0, %v1121_v48 }
 0xe86   :  { %1122 = vrcp.f32 %v680_v49 }
 0xe93   :  { %v1123_v0 = vpop.eup %1122 }
 0xe94   :  { %v689_v51 = vmul.f32 %v1123_v0, %v687_v18 }
 0xef4   :  { %v692_v50 = vpop.permute.xlu0 %691 }
 0xef5   :  { %v694_v10 = vmul.f32 %v1123_v0, %v692_v50 }
 0xef7   :  { %696 = vrot.lane.b32.xlu0 %v694_v10, %s1146_s30 }
 0xf69   :  { %v697_v52 = vpop.permute.xlu0 %696 }
 0xf6a   :  { %v699_v53 = vadd.f32 %v697_v52, %v689_v51 }
 0xf6c   :  { %1124 = vtanh.f32 %v699_v53 }
 0xf79   :  { %v1125_v54 = vpop.eup %1124 }
 0xf7a   :  { %702 = vrot.lane.b32.xlu1 %v1125_v54, %s1145_s29 }
 0xf7e   :  { %707 = vrot.lane.b32.xlu1 %v699_v53, %s1147_s3 }
 0xfec   :  { %v703_v55 = vpop.permute.xlu1 %702 }
 0xfed   :  { %v1363_v56 = vmul.f32 %v1123_v0, %v703_v55 }
 0xfef   :  { %v963_v57 = vpack.c.bf16 %v1363_v56, %v1363_v56 }
 0xff0   :  { %v708_v41 = vpop.permute.xlu1 %707 }
 0xff1   :  { %710 = vst.msk [vmem:[#allocation4] sm:$0xff] %vm24_vm2, %v708_v41  ;;  %715 = vrot.lane.b32.xlu0 %v963_v57, %s1146_s30 }
 0xff8   :  { %v779_v58 = vld [vmem:[#allocation4] sm:$0xff] }
 0xff9   :  { %781 = vrot.lane.b32.xlu1 %v779_v58, %s1146_s30 }
0x1063   :  { %v716_v59 = vpop.permute.xlu0 %715 }
0x1064   :  { %718 = vst.msk [vmem:[#allocation3] sm:$0xf] %vm22_vm0, %v716_v59 }
0x106b   :  { %v727_v60 = vld [vmem:[#allocation3] sm:$0xf]  ;;  %v782_v15 = vpop.permute.xlu1 %781 }
0x106c   :  { %1058 = vmatmul.mubr.msk.bf16.vlgmr.msra.gmra.mxu0 %vm24_vm2, %v727_v60 }
0x112c   :  { %v765_v62 = vpop.f32.mrf.mxu0 }
0x112d   :  { %v771_v1 = vadd.f32 %v765_v62, %v125_v61 }
0x112e   :  { %v1059_v3 = vpop.f32.mrf.mxu0 }
0x112f   :  { %1126 = vtanh.f32 %v771_v1  ;;  %v951_v8 = vmul.f32 -1.442695, %v771_v1 }
0x1130   :  { %v768_v4 = vpop.f32.mrf.mxu0 }
0x1131   :  { %1128 = vpow2.f32 %v951_v8 }
0x1132   :  { %v1060_v5 = vpop.f32.mrf.mxu0 }
0x113c   :  { %v1127_v7 = vpop.eup %1126 }
0x113d   :  { %786 = vrot.lane.b32.xlu0 %v1127_v7, %s1145_s29 }
0x113e   :  { %v1129_v9 = vpop.eup %1128 }
0x113f   :  { %v775_v11 = vadd.f32 1.0, %v1129_v9 }
0x1141   :  { %1130 = vrcp.f32 %v775_v11 }
0x114e   :  { %v1131_v14 = vpop.eup %1130 }
0x114f   :  { %v784_v21 = vmul.f32 %v1131_v14, %v782_v15 }
0x11af   :  { %v787_v19 = vpop.permute.xlu0 %786 }
0x11b0   :  { %v789_v20 = vmul.f32 %v1131_v14, %v787_v19 }
0x11b2   :  { %791 = vrot.lane.b32.xlu0 %v789_v20, %s1146_s30 }
0x1224   :  { %v792_v22 = vpop.permute.xlu0 %791 }
0x1225   :  { %v794_v23 = vadd.f32 %v792_v22, %v784_v21 }
0x1227   :  { %1132 = vtanh.f32 %v794_v23 }
0x1234   :  { %v1133_v24 = vpop.eup %1132 }
0x1235   :  { %797 = vrot.lane.b32.xlu1 %v1133_v24, %s1145_s29 }
0x1239   :  { %802 = vrot.lane.b32.xlu1 %v794_v23, %s1147_s3 }
0x12a7   :  { %v798_v25 = vpop.permute.xlu1 %797 }
0x12a8   :  { %v800_v26 = vmul.f32 %v1131_v14, %v798_v25 }
0x12aa   :  { %v964_v27 = vpack.c.bf16 %v800_v26, %v800_v26 }
0x12ab   :  { %v803_v16 = vpop.permute.xlu1 %802 }
0x12ac   :  { %805 = vst.msk [vmem:[#allocation4] sm:$0xff] %vm24_vm2, %v803_v16  ;;  %810 = vrot.lane.b32.xlu0 %v964_v27, %s1146_s30 }
0x12b3   :  { %v874_v28 = vld [vmem:[#allocation4] sm:$0xff] }
0x12b4   :  { %876 = vrot.lane.b32.xlu1 %v874_v28, %s1146_s30 }
0x131e   :  { %v811_v29 = vpop.permute.xlu0 %810 }
0x131f   :  { %813 = vst.msk [vmem:[#allocation3] sm:$0xf] %vm22_vm0, %v811_v29 }
0x1326   :  { %v822_v30 = vld [vmem:[#allocation3] sm:$0xf]  ;;  %v877_v13 = vpop.permute.xlu1 %876 }
0x1327   :  { %1066 = vmatmul.mubr.msk.bf16.vlgmr.msra.gmra.mxu1 %vm24_vm2, %v822_v30 }
0x13e7   :  { %v860_v12 = vpop.f32.mrf.mxu1 }
0x13e8   :  { %v866_v33 = vadd.f32 %v860_v12, %v128_v31 }
0x13e9   :  { %v1067_v34 = vpop.f32.mrf.mxu1 }
0x13ea   :  { %1134 = vtanh.f32 %v866_v33  ;;  %v955_v40 = vmul.f32 -1.442695, %v866_v33 }
0x13eb   :  { %v863_v36 = vpop.f32.mrf.mxu1 }
0x13ec   :  { %1136 = vpow2.f32 %v955_v40 }
0x13ed   :  { %v1068_v37 = vpop.f32.mrf.mxu1 }
0x13f7   :  { %v1135_v39 = vpop.eup %1134 }
0x13f8   :  { %881 = vrot.lane.b32.xlu0 %v1135_v39, %s1145_s29 }
0x13f9   :  { %v1137_v42 = vpop.eup %1136 }
0x13fa   :  { %v870_v43 = vadd.f32 1.0, %v1137_v42 }
0x13fc   :  { %1138 = vrcp.f32 %v870_v43 }
0x1409   :  { %v1139_v44 = vpop.eup %1138 }
0x140a   :  { %v879_v17 = vmul.f32 %v1139_v44, %v877_v13 }
0x146a   :  { %v882_v45 = vpop.permute.xlu0 %881 }
0x146b   :  { %v884_v46 = vmul.f32 %v1139_v44, %v882_v45 }
0x146d   :  { %886 = vrot.lane.b32.xlu0 %v884_v46, %s1146_s30 }
0x1471   :  { %246 = vrot.lane.b32.xlu0 %v1235_v35, %s1146_s30 }
0x1475   :  { %435 = vrot.lane.b32.xlu0 %v1302_v38, %s1146_s30 }
0x1479   :  { %625 = vrot.lane.b32.xlu0 %v1343_v32, %s1146_s30 }
0x147d   :  { %815 = vrot.lane.b32.xlu0 %v800_v26, %s1146_s30 }
0x14df   :  { %v887_v47 = vpop.permute.xlu0 %886 }
0x14e0   :  { %v889_v2 = vadd.f32 %v887_v47, %v879_v17 }
0x14e2   :  { %1140 = vtanh.f32 %v889_v2 }
0x14e3   :  { %v247_v48 = vpop.permute.xlu0 %246 }
0x14e4   :  { %249 = vst.msk [vmem:[%s1442_s4] sm:$0xff] %vm24_vm2, %v247_v48 }
0x14e7   :  { %v436_v35 = vpop.permute.xlu0 %435 }
0x14e8   :  { %937 = vst.msk [vmem:[%s1442_s4 + $0x10] sm:$0xff] %vm24_vm2, %v436_v35 }
0x14eb   :  { %v626_v38 = vpop.permute.xlu0 %625 }
0x14ec   :  { %945 = vst.msk [vmem:[%s1442_s4 + $0x20] sm:$0xff] %vm24_vm2, %v626_v38 }
0x14ef   :  { %v1141_v32 = vpop.eup %1140  ;;  %v816_v49 = vpop.permute.xlu0 %815 }
0x14f0   :  { %953 = vst.msk [vmem:[%s1442_s4 + $0x30] sm:$0xff] %vm24_vm2, %v816_v49  ;;  %892 = vrot.lane.b32.xlu1 %v1141_v32, %s1145_s29 }
0x14f4   :  { %340 = vrot.lane.b32.xlu1 %v1273_v6, %s1146_s30 }
0x14f8   :  { %530 = vrot.lane.b32.xlu1 %v1323_v63, %s1146_s30 }
0x14fc   :  { %720 = vrot.lane.b32.xlu1 %v1363_v56, %s1146_s30 }
0x1500   :  { %897 = vrot.lane.b32.xlu1 %v889_v2, %s1147_s3 }
0x1562   :  { %v893_v0 = vpop.permute.xlu1 %892 }
0x1563   :  { %v895_v50 = vmul.f32 %v1139_v44, %v893_v0 }
0x1565   :  { %v965_v10 = vpack.c.bf16 %v895_v50, %v895_v50  ;;  %910 = vrot.lane.b32.xlu1 %v895_v50, %s1146_s30 }
0x1566   :  { %v341_v18 = vpop.permute.xlu1 %340 }
0x1567   :  { %933 = vst.msk [vmem:[%s1442_s4 + $0x8] sm:$0xff] %vm24_vm2, %v341_v18  ;;  %905 = vrot.lane.b32.xlu0 %v965_v10, %s1146_s30 }
0x156a   :  { %v531_v6 = vpop.permute.xlu1 %530 }
0x156b   :  { %941 = vst.msk [vmem:[%s1442_s4 + $0x18] sm:$0xff] %vm24_vm2, %v531_v6 }
0x156e   :  { %v721_v63 = vpop.permute.xlu1 %720 }
0x156f   :  { %949 = vst.msk [vmem:[%s1442_s4 + $0x28] sm:$0xff] %vm24_vm2, %v721_v63 }
0x1572   :  { %v898_v51 = vpop.permute.xlu1 %897 }
0x1573   :  { %900 = vst.msk [vmem:[#allocation4] sm:$0xff] %vm24_vm2, %v898_v51 }
0x15d7   :  { %v911_v52 = vpop.permute.xlu1 %910 }
0x15d8   :  { %957 = vst.msk [vmem:[%s1442_s4 + $0x38] sm:$0xff] %vm24_vm2, %v911_v52 }
0x15d9   :  { %v906_v53 = vpop.permute.xlu0 %905 }
0x15da   :  { %908 = vst.msk [vmem:[#allocation3] sm:$0xf] %vm22_vm0, %v906_v53 }

</bundles_post_ra>
